<compile_context>
chip_gen: v7x
topology: tpu7x:2x2x1
jax: 0.10.0
libtpu: 0.0.40
codegen_flags: <defaults>
</compile_context>

<pallas_src>
import functools

import jax
import jax.numpy as jnp
from jax import lax
from jax.experimental import pallas as pl
from jax.experimental.pallas import tpu as pltpu

_LANE = 128
_HALO_ROWS = 8   # halo block height (multiple of 8 keeps the flat halo BlockSpec 8-aligned)


def _conv_bn_relu_kernel(x_main_ref, x_halo_ref, w_ref, b_ref, o_ref, xs_ref, *, wp):
    """One (batch, row-tile) grid step.

    x_main_ref : (1, tile_h*wp, C)   bf16, flat padded rows [i*tile_h, (i+1)*tile_h)
    x_halo_ref : (1, 8*wp, C)        bf16, flat padded rows [(i+1)*tile_h, (i+1)*tile_h+8)
    w_ref      : (9, C, Opad)        bf16 BN-folded conv weights, tap-major (kh*3+kw)
    b_ref      : (1, Opad)           f32 folded BN bias
    o_ref      : (1, tile_h*wp, Opad) bf16 output tile, flat (row, padded-col)-major
    xs_ref     : ((tile_h+8)*wp, C)  bf16 VMEM scratch: main tile + halo, contiguous
    """
    m0 = x_main_ref.shape[1]
    mh = x_halo_ref.shape[1]

    # Stitch main + halo rows into one contiguous bf16 buffer (both stores are
    # full-width and 8-aligned on the sublane axis).
    xs_ref[pl.ds(0, m0), :] = x_main_ref[0]
    xs_ref[pl.ds(m0, mh), :] = x_halo_ref[0]

    # 3x3 conv = 9 shifted (M, C) x (C, Opad) matmuls.  The spatial shift of each tap
    # is a static sublane-offset slice of the bf16 operand (zeros come from the
    # spatial padding done in the wrapper), so there is no roll and no mask.  Tap
    # results accumulate in a local f32 value; o_ref is touched exactly once.
    acc = None
    for dh in range(3):
        for dw in range(3):
            t = 3 * dh + dw
            s = dh * wp + dw                    # flat offset of this tap's source pixel
            xt = xs_ref[pl.ds(s, m0), :]        # (m0, C) bf16 operand
            p = jnp.dot(xt, w_ref[t], preferred_element_type=jnp.float32)
            acc = p if acc is None else acc + p

    y = jnp.maximum(acc + b_ref[0], 0.0)        # folded-BN bias + ReLU
    o_ref[0] = y.astype(o_ref.dtype)            # dense bf16 store (Opad % 128 == 0)


def _pick_tile_h(h8, wp, c, opad, budget_bytes):
    """Largest multiple-of-8 divisor of h8 whose per-step live VMEM fits the budget."""
    best = 8
    for th in range(8, h8 + 1, 8):
        if h8 % th:
            continue
        m0 = th * wp
        live = (2 * m0 * c * 2                       # main input block, double buffered, bf16
                + 2 * _HALO_ROWS * wp * c * 2        # halo block, double buffered
                + 2 * m0 * opad * 2                  # output block, double buffered, bf16
                + (th + _HALO_ROWS) * wp * c * 2     # xs scratch
                + 2 * m0 * opad * 4                  # f32 accumulator + one tap temporary
                + 2 * (9 * c * opad * 2 + opad * 4)) # weights + bias, double buffered
        if live <= budget_bytes:
            best = th
    return best


def conv_fuser_2d_nhwc(x_nhwc, weight_oihw, gamma, beta, running_mean, running_var,
                       eps=1e-5, tile_h=None):
    """Fused Conv2d(3x3, pad=1, no bias) + eval-BatchNorm + ReLU on NHWC input.

    x_nhwc : (N, H, W, C) channel-concatenated [img, pts] features (any float dtype).
    Returns (N, H, W, O) bfloat16.
    """
    n, h, w, c = x_nhwc.shape
    o = weight_oihw.shape[0]
    assert weight_oihw.shape == (o, c, 3, 3), weight_oihw.shape

    opad = ((o + _LANE - 1) // _LANE) * _LANE
    wp = w + 2                        # padded width (left/right conv halo columns)
    h8 = ((h + 7) // 8) * 8           # pad rows so an 8-aligned row tile always exists

    # ---- Fold eval-mode BatchNorm into the conv weights / bias (trace time). ------
    scale = (gamma.astype(jnp.float32)
             / jnp.sqrt(running_var.astype(jnp.float32) + eps))
    bias = beta.astype(jnp.float32) - running_mean.astype(jnp.float32) * scale
    w_f = weight_oihw.astype(jnp.float32) * scale[:, None, None, None]   # (O, C, 3, 3)
    w_taps = jnp.transpose(w_f, (2, 3, 1, 0)).reshape(9, c, o)           # (9, C, O)
    w_taps = jnp.pad(w_taps, ((0, 0), (0, 0), (0, opad - o))).astype(jnp.bfloat16)
    bias_pad = jnp.pad(bias, (0, opad - o)).reshape(1, opad)

    # ---- Generation-aware VMEM budget and row-tile size. ---------------------------
    try:
        vmem_cap = int(pltpu.get_tpu_info().vmem_capacity_bytes)
    except Exception:                 # not on TPU hardware / interpret mode
        vmem_cap = 128 * 1024 * 1024
    vmem_limit = int(vmem_cap * 0.85)
    if tile_h is None:
        tile_h = _pick_tile_h(h8, wp, c, opad, budget_bytes=int(vmem_cap * 0.40))
    assert tile_h % 8 == 0 and h8 % tile_h == 0, (tile_h, h8)
    n_tiles = h8 // tile_h

    # ---- Spatial zero padding (conv halo + tile alignment), flattened row-major. ---
    # Padded image P: 1 row on top, (h8 - h) + HALO - 1 rows at the bottom, 1 column
    # on each side.  Flattening (row, col) into one axis in HBM is free and keeps
    # every BlockSpec block a plain 8-aligned run of sublanes (no in-kernel reshapes).
    xp = jnp.pad(x_nhwc.astype(jnp.bfloat16),
                 ((0, 0), (1, h8 - h + _HALO_ROWS - 1), (1, 1), (0, 0)))
    xp_flat = xp.reshape(n, (h8 + _HALO_ROWS) * wp, c)

    m0 = tile_h * wp
    mh = _HALO_ROWS * wp
    kernel = functools.partial(_conv_bn_relu_kernel, wp=wp)

    out_flat = pl.pallas_call(
        kernel,
        out_shape=jax.ShapeDtypeStruct((n, h8 * wp, opad), jnp.bfloat16),
        grid_spec=pltpu.PrefetchScalarGridSpec(
            num_scalar_prefetch=0,
            grid=(n, n_tiles),
            in_specs=[
                # Main rows of this tile: padded rows [i*tile_h, (i+1)*tile_h).
                pl.BlockSpec((1, m0, c), lambda b, i: (b, i, 0)),
                # Halo: the 8 padded rows just below the tile (conv uses the first 2).
                pl.BlockSpec((1, mh, c),
                             lambda b, i: (b, (i + 1) * (tile_h // _HALO_ROWS), 0)),
                # BN-folded weights / bias: constant across the grid (no re-DMA).
                # TODO(synk): single-buffer these (pl.Buffered(1)) to reclaim VMEM.
                pl.BlockSpec((9, c, opad), lambda b, i: (0, 0, 0)),
                pl.BlockSpec((1, opad), lambda b, i: (0, 0)),
            ],
            out_specs=pl.BlockSpec((1, m0, opad), lambda b, i: (b, i, 0)),
            scratch_shapes=[pltpu.VMEM(((tile_h + _HALO_ROWS) * wp, c), jnp.bfloat16)],
        ),
        compiler_params=pltpu.CompilerParams(
            dimension_semantics=("parallel", "parallel"),
            vmem_limit_bytes=vmem_limit),
    )(xp_flat, xp_flat, w_taps, bias_pad)

    # Un-flatten and drop padded rows / halo columns / padded output channels.
    out = out_flat.reshape(n, h8, wp, opad)[:, :h, :w, :o]
    return out


def conv_fuser_2d(img_voxel_feats, pts_voxel_feats, weight_oihw,
                  gamma, beta, running_mean, running_var, eps=1e-5,
                  tile_h=None, out_dtype=jnp.float32):
    """ConvFuser2D.forward: NCHW in, NCHW out (eval-mode BatchNorm).

    img_voxel_feats : (N, C_img, H, W), pts_voxel_feats : (N, C_pts, H, W)
    weight_oihw     : (O, C_img + C_pts, 3, 3)  PyTorch Conv2d weight layout.
    For production, prefer conv_fuser_2d_nhwc with NHWC/bf16 activations end-to-end;
    the NCHW<->NHWC transposes below are each a full HBM round trip.
    """
    img_nhwc = jnp.transpose(img_voxel_feats, (0, 2, 3, 1))
    pts_nhwc = jnp.transpose(pts_voxel_feats, (0, 2, 3, 1))
    x = jnp.concatenate([img_nhwc, pts_nhwc], axis=-1)   # channel concat fused w/ layout
    y = conv_fuser_2d_nhwc(x, weight_oihw, gamma, beta, running_mean, running_var,
                           eps=eps, tile_h=tile_h)
    return jnp.transpose(y, (0, 3, 1, 2)).astype(out_dtype)


def _reference(img, pts, weight_oihw, gamma, beta, mean, var, eps=1e-5):
    # Mirror the kernel's bf16 quantization of activations / folded weights so the
    # comparison checks the conv/BN/ReLU math rather than bf16 rounding.
    scale = gamma / jnp.sqrt(var + eps)
    bias = beta - mean * scale
    w_folded = (weight_oihw.astype(jnp.float32) * scale[:, None, None, None])
    w_folded = w_folded.astype(jnp.bfloat16).astype(jnp.float32)
    x = jnp.concatenate([img, pts], axis=1).astype(jnp.bfloat16).astype(jnp.float32)
    y = lax.conv_general_dilated(
        x, w_folded, window_strides=(1, 1), padding=((1, 1), (1, 1)),
        dimension_numbers=("NCHW", "OIHW", "NCHW"),
        preferred_element_type=jnp.float32)
    return jnp.maximum(y + bias.reshape(1, -1, 1, 1), 0.0)


if __name__ == "__main__":
    # Small synthetic config consistent with the module:
    # in_channels = [4, 4] -> sum = 8, out_channels = 16, batch = 2, spatial = 16x16.
    N, H, W = 2, 16, 16
    in_channels = [4, 4]
    C = sum(in_channels)
    O = 16

    key = jax.random.PRNGKey(0)
    k_img, k_pts, k_w, k_g, k_b, k_m, k_v = jax.random.split(key, 7)

    img_voxel_feats = jax.random.normal(k_img, (N, in_channels[0], H, W), jnp.float32)
    pts_voxel_feats = jax.random.normal(k_pts, (N, in_channels[1], H, W), jnp.float32)

    weight = jax.random.normal(k_w, (O, C, 3, 3), jnp.float32) * 0.1
    gamma = 1.0 + 0.1 * jax.random.normal(k_g, (O,), jnp.float32)
    beta = 0.1 * jax.random.normal(k_b, (O,), jnp.float32)
    running_mean = 0.1 * jax.random.normal(k_m, (O,), jnp.float32)
    running_var = jnp.abs(1.0 + 0.1 * jax.random.normal(k_v, (O,), jnp.float32))

    ref = jax.block_until_ready(
        _reference(img_voxel_feats, pts_voxel_feats, weight,
                   gamma, beta, running_mean, running_var))

    # Multi-tile path (2 row tiles of 8 rows each -> exercises the halo stitch).
    out = jax.block_until_ready(
        conv_fuser_2d(img_voxel_feats, pts_voxel_feats, weight,
                      gamma, beta, running_mean, running_var, tile_h=8))
    assert out.shape == (N, O, H, W), out.shape
    assert jnp.allclose(out, ref, atol=3e-2, rtol=3e-2), \
        f"tiled mismatch: max |diff| = {jnp.max(jnp.abs(out - ref))}"

    # Default (VMEM-budget-chosen) tile size.
    out2 = jax.block_until_ready(
        conv_fuser_2d(img_voxel_feats, pts_voxel_feats, weight,
                      gamma, beta, running_mean, running_var))
    assert jnp.allclose(out2, ref, atol=3e-2, rtol=3e-2), \
        f"default-tile mismatch: max |diff| = {jnp.max(jnp.abs(out2 - ref))}"

    print("KERNEL_OK")
</pallas_src>

<mosaic_0001>
module attributes {stable_mosaic.version = 11 : i64} {
  func.func @_conv_bn_relu_kernel(%arg0: i32, %arg1: i32, %arg2: memref<1x144x8xbf16, #tpu.memory_space<vmem>>, %arg3: memref<1x144x8xbf16, #tpu.memory_space<vmem>>, %arg4: memref<9x8x128xbf16, #tpu.memory_space<vmem>>, %arg5: memref<1x128xf32, #tpu.memory_space<vmem>>, %arg6: memref<1x144x128xbf16, #tpu.memory_space<vmem>>, %arg7: memref<288x8xbf16, #tpu.memory_space<vmem>>) attributes {dimension_semantics = [#tpu.dimension_semantics<parallel>, #tpu.dimension_semantics<parallel>], iteration_bounds = array<i64: 2, 2>, scalar_prefetch = 0 : i64, scratch_operands = 1 : i64, tpu.core_type = #tpu.core_type<tc>, window_params = [{transform_indices = @transform_0, window_bounds = array<i64: 1, 144, 8>}, {transform_indices = @transform_1, window_bounds = array<i64: 1, 144, 8>}, {pipeline_mode = #tpu.pipeline_mode<synchronous>, transform_indices = @transform_2, window_bounds = array<i64: 9, 8, 128>}, {pipeline_mode = #tpu.pipeline_mode<synchronous>, transform_indices = @transform_3, window_bounds = array<i64: 1, 128>}, {transform_indices = @transform_4, window_bounds = array<i64: 1, 144, 128>}]} {
    %c0 = arith.constant 0 : index
    %c0_0 = arith.constant 0 : index
    %c0_1 = arith.constant 0 : index
    %0 = vector.load %arg2[%c0, %c0_0, %c0_1] : memref<1x144x8xbf16, #tpu.memory_space<vmem>>, vector<1x144x8xbf16>
    %1 = vector.shape_cast %0 : vector<1x144x8xbf16> to vector<144x8xbf16>
    %c0_2 = arith.constant 0 : index
    %c0_3 = arith.constant 0 : index
    %2 = vector.load %arg7[%c0_2, %c0_3] : memref<288x8xbf16, #tpu.memory_space<vmem>>, vector<144x8xbf16>
    tpu.vector_store %arg7[%c0_2, %c0_3], %1 {strides = array<i32>} : memref<288x8xbf16, #tpu.memory_space<vmem>>, vector<144x8xbf16>,
    %c0_4 = arith.constant 0 : index
    %c0_5 = arith.constant 0 : index
    %c0_6 = arith.constant 0 : index
    %3 = vector.load %arg3[%c0_4, %c0_5, %c0_6] : memref<1x144x8xbf16, #tpu.memory_space<vmem>>, vector<1x144x8xbf16>
    %4 = vector.shape_cast %3 : vector<1x144x8xbf16> to vector<144x8xbf16>
    %c144 = arith.constant 144 : index
    %c0_7 = arith.constant 0 : index
    %5 = vector.load %arg7[%c144, %c0_7] : memref<288x8xbf16, #tpu.memory_space<vmem>>, vector<144x8xbf16>
    tpu.vector_store %arg7[%c144, %c0_7], %4 {strides = array<i32>} : memref<288x8xbf16, #tpu.memory_space<vmem>>, vector<144x8xbf16>,
    %c0_8 = arith.constant 0 : index
    %c0_9 = arith.constant 0 : index
    %6 = vector.load %arg7[%c0_8, %c0_9] : memref<288x8xbf16, #tpu.memory_space<vmem>>, vector<144x8xbf16>
    %c0_10 = arith.constant 0 : index
    %c0_11 = arith.constant 0 : index
    %c0_12 = arith.constant 0 : index
    %7 = vector.load %arg4[%c0_10, %c0_11, %c0_12] : memref<9x8x128xbf16, #tpu.memory_space<vmem>>, vector<1x8x128xbf16>
    %8 = vector.shape_cast %7 : vector<1x8x128xbf16> to vector<8x128xbf16>
    %cst = arith.constant dense<0.000000e+00> : vector<144x128xf32>
    %9 = tpu.matmul %6, %8, %cst {dimension_numbers = #tpu.dot_dimension_numbers<[1], [0], [0], [1], [0, 0, 1, 1], [], []>} : vector<144x8xbf16>, vector<8x128xbf16>, vector<144x128xf32> -> vector<144x128xf32>
    %c1 = arith.constant 1 : index
    %c0_13 = arith.constant 0 : index
    %10 = vector.load %arg7[%c1, %c0_13] : memref<288x8xbf16, #tpu.memory_space<vmem>>, vector<144x8xbf16>
    %c1_14 = arith.constant 1 : index
    %c0_15 = arith.constant 0 : index
    %c0_16 = arith.constant 0 : index
    %11 = vector.load %arg4[%c1_14, %c0_15, %c0_16] : memref<9x8x128xbf16, #tpu.memory_space<vmem>>, vector<1x8x128xbf16>
    %12 = vector.shape_cast %11 : vector<1x8x128xbf16> to vector<8x128xbf16>
    %cst_17 = arith.constant dense<0.000000e+00> : vector<144x128xf32>
    %13 = tpu.matmul %10, %12, %cst_17 {dimension_numbers = #tpu.dot_dimension_numbers<[1], [0], [0], [1], [0, 0, 1, 1], [], []>} : vector<144x8xbf16>, vector<8x128xbf16>, vector<144x128xf32> -> vector<144x128xf32>
    %14 = arith.addf %9, %13 : vector<144x128xf32>
    %c2 = arith.constant 2 : index
    %c0_18 = arith.constant 0 : index
    %15 = vector.load %arg7[%c2, %c0_18] : memref<288x8xbf16, #tpu.memory_space<vmem>>, vector<144x8xbf16>
    %c2_19 = arith.constant 2 : index
    %c0_20 = arith.constant 0 : index
    %c0_21 = arith.constant 0 : index
    %16 = vector.load %arg4[%c2_19, %c0_20, %c0_21] : memref<9x8x128xbf16, #tpu.memory_space<vmem>>, vector<1x8x128xbf16>
    %17 = vector.shape_cast %16 : vector<1x8x128xbf16> to vector<8x128xbf16>
    %cst_22 = arith.constant dense<0.000000e+00> : vector<144x128xf32>
    %18 = tpu.matmul %15, %17, %cst_22 {dimension_numbers = #tpu.dot_dimension_numbers<[1], [0], [0], [1], [0, 0, 1, 1], [], []>} : vector<144x8xbf16>, vector<8x128xbf16>, vector<144x128xf32> -> vector<144x128xf32>
    %19 = arith.addf %14, %18 : vector<144x128xf32>
    %c18 = arith.constant 18 : index
    %c0_23 = arith.constant 0 : index
    %20 = vector.load %arg7[%c18, %c0_23] : memref<288x8xbf16, #tpu.memory_space<vmem>>, vector<144x8xbf16>
    %c3 = arith.constant 3 : index
    %c0_24 = arith.constant 0 : index
    %c0_25 = arith.constant 0 : index
    %21 = vector.load %arg4[%c3, %c0_24, %c0_25] : memref<9x8x128xbf16, #tpu.memory_space<vmem>>, vector<1x8x128xbf16>
    %22 = vector.shape_cast %21 : vector<1x8x128xbf16> to vector<8x128xbf16>
    %cst_26 = arith.constant dense<0.000000e+00> : vector<144x128xf32>
    %23 = tpu.matmul %20, %22, %cst_26 {dimension_numbers = #tpu.dot_dimension_numbers<[1], [0], [0], [1], [0, 0, 1, 1], [], []>} : vector<144x8xbf16>, vector<8x128xbf16>, vector<144x128xf32> -> vector<144x128xf32>
    %24 = arith.addf %19, %23 : vector<144x128xf32>
    %c19 = arith.constant 19 : index
    %c0_27 = arith.constant 0 : index
    %25 = vector.load %arg7[%c19, %c0_27] : memref<288x8xbf16, #tpu.memory_space<vmem>>, vector<144x8xbf16>
    %c4 = arith.constant 4 : index
    %c0_28 = arith.constant 0 : index
    %c0_29 = arith.constant 0 : index
    %26 = vector.load %arg4[%c4, %c0_28, %c0_29] : memref<9x8x128xbf16, #tpu.memory_space<vmem>>, vector<1x8x128xbf16>
    %27 = vector.shape_cast %26 : vector<1x8x128xbf16> to vector<8x128xbf16>
    %cst_30 = arith.constant dense<0.000000e+00> : vector<144x128xf32>
    %28 = tpu.matmul %25, %27, %cst_30 {dimension_numbers = #tpu.dot_dimension_numbers<[1], [0], [0], [1], [0, 0, 1, 1], [], []>} : vector<144x8xbf16>, vector<8x128xbf16>, vector<144x128xf32> -> vector<144x128xf32>
    %29 = arith.addf %24, %28 : vector<144x128xf32>
    %c20 = arith.constant 20 : index
    %c0_31 = arith.constant 0 : index
    %30 = vector.load %arg7[%c20, %c0_31] : memref<288x8xbf16, #tpu.memory_space<vmem>>, vector<144x8xbf16>
    %c5 = arith.constant 5 : index
    %c0_32 = arith.constant 0 : index
    %c0_33 = arith.constant 0 : index
    %31 = vector.load %arg4[%c5, %c0_32, %c0_33] : memref<9x8x128xbf16, #tpu.memory_space<vmem>>, vector<1x8x128xbf16>
    %32 = vector.shape_cast %31 : vector<1x8x128xbf16> to vector<8x128xbf16>
    %cst_34 = arith.constant dense<0.000000e+00> : vector<144x128xf32>
    %33 = tpu.matmul %30, %32, %cst_34 {dimension_numbers = #tpu.dot_dimension_numbers<[1], [0], [0], [1], [0, 0, 1, 1], [], []>} : vector<144x8xbf16>, vector<8x128xbf16>, vector<144x128xf32> -> vector<144x128xf32>
    %34 = arith.addf %29, %33 : vector<144x128xf32>
    %c36 = arith.constant 36 : index
    %c0_35 = arith.constant 0 : index
    %35 = vector.load %arg7[%c36, %c0_35] : memref<288x8xbf16, #tpu.memory_space<vmem>>, vector<144x8xbf16>
    %c6 = arith.constant 6 : index
    %c0_36 = arith.constant 0 : index
    %c0_37 = arith.constant 0 : index
    %36 = vector.load %arg4[%c6, %c0_36, %c0_37] : memref<9x8x128xbf16, #tpu.memory_space<vmem>>, vector<1x8x128xbf16>
    %37 = vector.shape_cast %36 : vector<1x8x128xbf16> to vector<8x128xbf16>
    %cst_38 = arith.constant dense<0.000000e+00> : vector<144x128xf32>
    %38 = tpu.matmul %35, %37, %cst_38 {dimension_numbers = #tpu.dot_dimension_numbers<[1], [0], [0], [1], [0, 0, 1, 1], [], []>} : vector<144x8xbf16>, vector<8x128xbf16>, vector<144x128xf32> -> vector<144x128xf32>
    %39 = arith.addf %34, %38 : vector<144x128xf32>
    %c37 = arith.constant 37 : index
    %c0_39 = arith.constant 0 : index
    %40 = vector.load %arg7[%c37, %c0_39] : memref<288x8xbf16, #tpu.memory_space<vmem>>, vector<144x8xbf16>
    %c7 = arith.constant 7 : index
    %c0_40 = arith.constant 0 : index
    %c0_41 = arith.constant 0 : index
    %41 = vector.load %arg4[%c7, %c0_40, %c0_41] : memref<9x8x128xbf16, #tpu.memory_space<vmem>>, vector<1x8x128xbf16>
    %42 = vector.shape_cast %41 : vector<1x8x128xbf16> to vector<8x128xbf16>
    %cst_42 = arith.constant dense<0.000000e+00> : vector<144x128xf32>
    %43 = tpu.matmul %40, %42, %cst_42 {dimension_numbers = #tpu.dot_dimension_numbers<[1], [0], [0], [1], [0, 0, 1, 1], [], []>} : vector<144x8xbf16>, vector<8x128xbf16>, vector<144x128xf32> -> vector<144x128xf32>
    %44 = arith.addf %39, %43 : vector<144x128xf32>
    %c38 = arith.constant 38 : index
    %c0_43 = arith.constant 0 : index
    %45 = vector.load %arg7[%c38, %c0_43] : memref<288x8xbf16, #tpu.memory_space<vmem>>, vector<144x8xbf16>
    %c8 = arith.constant 8 : index
    %c0_44 = arith.constant 0 : index
    %c0_45 = arith.constant 0 : index
    %46 = vector.load %arg4[%c8, %c0_44, %c0_45] : memref<9x8x128xbf16, #tpu.memory_space<vmem>>, vector<1x8x128xbf16>
    %47 = vector.shape_cast %46 : vector<1x8x128xbf16> to vector<8x128xbf16>
    %cst_46 = arith.constant dense<0.000000e+00> : vector<144x128xf32>
    %48 = tpu.matmul %45, %47, %cst_46 {dimension_numbers = #tpu.dot_dimension_numbers<[1], [0], [0], [1], [0, 0, 1, 1], [], []>} : vector<144x8xbf16>, vector<8x128xbf16>, vector<144x128xf32> -> vector<144x128xf32>
    %49 = arith.addf %44, %48 : vector<144x128xf32>
    %c0_47 = arith.constant 0 : index
    %c0_48 = arith.constant 0 : index
    %50 = vector.load %arg5[%c0_47, %c0_48] : memref<1x128xf32, #tpu.memory_space<vmem>>, vector<1x128xf32>
    %51 = vector.shape_cast %50 : vector<1x128xf32> to vector<128xf32>
    %52 = vector.shape_cast %51 : vector<128xf32> to vector<1x128xf32>
    %53 = vector.broadcast %52 : vector<1x128xf32> to vector<144x128xf32>
    %54 = arith.addf %49, %53 : vector<144x128xf32>
    %cst_49 = arith.constant 0.000000e+00 : f32
    %55 = vector.broadcast %cst_49 : f32 to vector<144x128xf32>
    %56 = arith.maximumf %54, %55 : vector<144x128xf32>
    %57 = arith.truncf %56 : vector<144x128xf32> to vector<144x128xbf16>
    %c0_50 = arith.constant 0 : index
    %c0_51 = arith.constant 0 : index
    %c0_52 = arith.constant 0 : index
    %58 = vector.load %arg6[%c0_50, %c0_51, %c0_52] : memref<1x144x128xbf16, #tpu.memory_space<vmem>>, vector<1x144x128xbf16>
    %59 = vector.shape_cast %58 : vector<1x144x128xbf16> to vector<144x128xbf16>
    %60 = vector.shape_cast %57 : vector<144x128xbf16> to vector<1x144x128xbf16>
    tpu.vector_store %arg6[%c0_50, %c0_51, %c0_52], %60 {strides = array<i32>} : memref<1x144x128xbf16, #tpu.memory_space<vmem>>, vector<1x144x128xbf16>,
    return
  }
  func.func @transform_0(%arg0: i32, %arg1: i32) -> (i32, i32, i32) {
    %c0_i32 = arith.constant 0 : i32
    %c0_i32_0 = arith.constant 0 : i32
    return %arg0, %arg1, %c0_i32 : i32, i32, i32
  }
  func.func @transform_1(%arg0: i32, %arg1: i32) -> (i32, i32, i32) {
    %c1_i32 = arith.constant 1 : i32
    %0 = arith.addi %arg1, %c1_i32 : i32
    %c1_i32_0 = arith.constant 1 : i32
    %1 = arith.muli %0, %c1_i32_0 : i32
    %c0_i32 = arith.constant 0 : i32
    %c0_i32_1 = arith.constant 0 : i32
    return %arg0, %1, %c0_i32 : i32, i32, i32
  }
  func.func @transform_2(%arg0: i32, %arg1: i32) -> (i32, i32, i32) {
    %c0_i32 = arith.constant 0 : i32
    %c0_i32_0 = arith.constant 0 : i32
    %c0_i32_1 = arith.constant 0 : i32
    %c0_i32_2 = arith.constant 0 : i32
    return %c0_i32, %c0_i32_0, %c0_i32_1 : i32, i32, i32
  }
  func.func @transform_3(%arg0: i32, %arg1: i32) -> (i32, i32) {
    %c0_i32 = arith.constant 0 : i32
    %c0_i32_0 = arith.constant 0 : i32
    %c0_i32_1 = arith.constant 0 : i32
    return %c0_i32, %c0_i32_0 : i32, i32
  }
  func.func @transform_4(%arg0: i32, %arg1: i32) -> (i32, i32, i32) {
    %c0_i32 = arith.constant 0 : i32
    %c0_i32_0 = arith.constant 0 : i32
    return %arg0, %arg1, %c0_i32 : i32, i32, i32
  }
}

</mosaic_0001>

<bundles_post_ra>
// kernel: tpu_custom_call.1
= control target key start
LH: loop header
LB: loop body
LE: loop exit
PB: predicated region body
PF: predicated region fallthrough
CT: control target
= control target key end

     0   :  { %s4802_s0 = inlined_call_operand.hbm [shape: bf16[2,432,8], index: 0, kind: input, shape index: {}]   ;;  %s4803_s1 = inlined_call_operand.hbm [shape: bf16[2,432,8], index: 1, kind: input, shape index: {}]   ;;  %s4804_s2 = inlined_call_operand.hbm [shape: bf16[9,8,128], index: 2, kind: input, shape index: {}]   ;;  %s4805_s3 = inlined_call_operand.hbm [shape: f32[1,128], index: 3, kind: input, shape index: {}]   ;;  %s4806_s4 = inlined_call_operand.hbm [shape: bf16[2,288,128], index: 4, kind: output, shape index: {}]  }
   0x1   :  { %4826 = sst [smem:[#allocation23_spill]] %s4802_s0 }
   0x2   :  { %4827 = sst [smem:[#allocation24_spill]] %s4804_s2 }
   0x3   :  { %4828 = sst [smem:[#allocation25_spill]] %s4805_s3 }
   0x4   :  { %4829 = sst [smem:[#allocation26_spill]] %s4806_s4 }
   0x5   :  { %9 = vsyncpa [#allocation4], 0 }
   0x6   :  { %11 = vsyncpa [#allocation4 + $0x1], 0 }
   0x7   :  { %12 = vsyncpa [#allocation7], 0 }
   0x8   :  { %14 = vsyncpa [#allocation7 + $0x1], 0 }
   0x9   :  { %15 = vsyncpa [#allocation10], 0 }
   0xa   :  { %16 = vsyncpa [#allocation5], 0 }
   0xb   :  { %18 = vsyncpa [#allocation5 + $0x1], 0  ;;  %s3619_s15 = smov 0   ;;  %s3621_s16 = smov 0  }
   0xc   :  { %s3623_s17 = smov 0   ;;  %s3625_s18 = smov 0  }
   0xd   :  { %s3627_s19 = smov 0   ;;  %s3629_s20 = smov 0  }
   0xe   :  { %s3631_s21 = smov 0   ;;  %s3633_s22 = smov 0  }
   0xf   :  { %s3635_s23 = smov 0   ;;  %s3637_s24 = smov 0  }
  0x10   :  { %s3639_s25 = smov 0  }
  0x11 LB: > { %4830 = sst [smem:[#allocation17_spill]] %s3553_s18  ;;  %s3673_s26 = sadd.s32 4294967295, %s3581_s25   ;;  %s3581_s25 = sphi %s3639_s25, %s24_s25   ;;  %s3577_s24 = sphi %s3637_s24, %s4867_s24   ;;  %s3573_s23 = sphi %s3635_s23, %s4875_s23   ;;  %s3569_s22 = sphi %s3633_s22, %s4865_s22   ;;  %s3565_s21 = sphi %s3631_s21, %s4874_s21   ;;  %s3561_s20 = sphi %s3629_s20, %s4873_s20   ;;  %s3557_s19 = sphi %s3627_s19, %s4872_s19   ;;  %s3553_s18 = sphi %s3625_s18, %s4871_s18   ;;  %s3549_s17 = sphi %s3623_s17, %s4870_s17   ;;  %s3545_s16 = sphi %s3621_s16, %s4869_s16   ;;  %s3541_s15 = sphi %s3619_s15, %s4868_s15  }
  0x12   : > { %4831 = sst [smem:[#allocation18_spill]] %s3577_s24  ;;  %s2536_s27 = sadd.s32 4294967294, %s3581_s25  }
  0x13   : > { %p58_p0 = scmp.ne.s32.totalorder %s3557_s19, %s3553_s18  ;;  %p4807_p1 = scmp.eq.s32.totalorder %s3673_s26, 0 }
  0x14   : > { %p88_p2 = scmp.ne.s32.totalorder %s3545_s16, %s3541_s15  ;;  %p162_p4 = scmp.eq.s32.totalorder %s2536_s27, 3 }
  0x15   : > { %p3682_p3 = por %p4807_p1, %p58_p0  ;;  %p2537_p6 = scmp.ge.s32.totalorder %s3581_s25, 1 }
  0x16   : > { %p3688_p5 = por %p88_p2, %p4807_p1  ;;  %p3693_p7 = por %p162_p4, %p58_p0 }
  0x17   : > { %s4832_s28 = scalar_select %p3682_p3, 1, 0 }
  0x18   : > { %s4833_s29 = scalar_select %p3688_p5, 1, 0 }
  0x19   : > { %s4834_s30 = scalar_select %p3693_p7, 1, 0 }
  0x1a   : > { %p169_p8 = scmp.lt.s32.totalorder %s3581_s25, 5  ;;  %s3583_s6 = smov [#allocation8]  }
  0x1b   : > { %4835 = sst [smem:[#allocation19_spill]] %s4834_s30  ;;  %s181_s7 = sshll.u32 %s3583_s6, 4  ;;  %s182_s7 = int_to_ptr.vmem [resolvable:$true] %s181_s7 }
  0x1c   : > { %p3698_p9 = pnand %p2537_p6, %p169_p8  ;;  %s3584_s9 = smov [#allocation9]  }
  0x1d   : > { %s195_s10 = sshll.u32 %s3584_s9, 4  ;;  %s4838_s2 = sld [smem:[#allocation24_spill]]  ;;  %s3710_s10 = int_to_ptr.vmem [resolvable:$true] %s195_s10 }
  0x1e   : > { %s4836_s5 = scalar_select %p3698_p9, 1, 0 }
  0x1f   : > { %p3192_p10 = pneg %p3698_p9 }
  0x21   : > { %p3706_p11 = pnand %p3192_p10, %p4807_p1 }
  0x23   : > { %s3330_s13 = scalar_lea.hbm %s4838_s2, 576  ;;  %p3332_p13 = pneg %p3706_p11 }
  0x24   : > { %p3331_p12 = scmp.ne.s32.totalorder %s4838_s2, %s3330_s13  ;;  %p3337_p4 = scmp.lt.u32.totalorder %s3330_s13, %s4838_s2 }
  0x26   : > { %p3333_p0 = pnand %p3332_p13, %p3331_p12 }
  0x28   : > { %p3334_p2 = pneg %p3333_p0 }
  0x2a   : > { %p3339_p6 = pnand %p3337_p4, %p3334_p2 }
  0x2c   : > { %3342 = shalt.err (!%p3339_p6)
}
  0x2d   : > { %s3343_s9 = scalar_lea.vmem %s182_s7, 576  ;;  %p3351_p7 = scmp.lt.s32.totalorder %s182_s7, %s182_s7 }
  0x2e   : > { %p3344_p8 = scmp.ne.s32.totalorder %s182_s7, %s3343_s9  ;;  %p3352_p5 = scmp.lt.s32.totalorder %s3343_s9, %s3343_s9 }
  0x30   : > { %p3346_p10 = pnand %p3344_p8, %p3332_p13  ;;  %p3353_p3 = por %p3352_p5, %p3351_p7 }
  0x32   : > { %p3347_p1 = pneg %p3346_p10 }
  0x34   : > { %p3354_p9 = pnand %p3353_p3, %p3347_p1 }
  0x36   : > { %3357 = shalt.err (!%p3354_p9)
}
  0x37   : > { %s4814_s11 = smov 64   ;;  %s4816_s12 = smov 4  }
  0x38   : > { %3195 = dma.hbm_to_vmem [thread:$0]  (!%p3706_p11), %s4838_s2, 576, %s182_s7, [#allocation7], %s4814_s11, %s4814_s11, %s4816_s12  }
  0x39   : > { %s4839_s3 = sld [smem:[#allocation25_spill]] }
  0x3f   : > { %s3358_s6 = scalar_lea.hbm %s4839_s3, 16 }
  0x40   : > { %p3359_p1 = scmp.ne.s32.totalorder %s4839_s3, %s3358_s6  ;;  %p3365_p7 = scmp.lt.u32.totalorder %s3358_s6, %s4839_s3 }
  0x42   : > { %p3361_p3 = pnand %p3359_p1, %p3332_p13 }
  0x44   : > { %p3362_p5 = pneg %p3361_p3 }
  0x46   : > { %p3367_p9 = pnand %p3365_p7, %p3362_p5 }
  0x48   : > { %3370 = shalt.err (!%p3367_p9)
}
  0x49   : > { %s3371_s7 = scalar_lea.vmem %s3710_s10, 16  ;;  %s3378_s30 = scalar_lea.vmem %s3710_s10, 32 }
  0x4a   : > { %p3372_p12 = scmp.ne.s32.totalorder %s3710_s10, %s3371_s7  ;;  %p3379_p4 = scmp.lt.s32.totalorder %s3710_s10, %s3710_s10 }
  0x4b   : > { %p3380_p6 = scmp.lt.s32.totalorder %s3378_s30, %s3371_s7 }
  0x4c   : > { %p3374_p0 = pnand %p3372_p12, %p3332_p13 }
  0x4d   : > { %p3381_p8 = por %p3380_p6, %p3379_p4 }
  0x4e   : > { %p3375_p2 = pneg %p3374_p0 }
  0x50   : > { %p3382_p10 = pnand %p3381_p8, %p3375_p2 }
  0x52   : > { %3385 = shalt.err (!%p3382_p10)
}
  0x53   : > { %3198 = dma.hbm_to_vmem [thread:$0]  (!%p3706_p11), %s4839_s3, 16, %s3710_s10, [#allocation10]  }
  0x54   : > { %p156_p13 = scmp.eq.s32.totalorder %s3673_s26, 3  ;;  %s33_s13 = sadd.s32 1, %s3573_s23 }
  0x55   : > { %p34_p1 = scmp.ge.s32.totalorder %s33_s13, 2  ;;  %s36_s8 = sadd.s32 1, %s3577_s24 }
  0x56   : > { %p52_p3 = scmp.ne.s32.totalorder %s3561_s20, %s3557_s19  ;;  %p4822_p5 = scmp.eq.s32.totalorder %s3581_s25, 0 }
  0x57   : > { %s3769_s14 = scalar_select %p34_p1, 0, %s33_s13  }
  0x58   : > { %s4877_s8 = smov (!%p34_p1, %s36_s8), %s3577_s24  ;;  %s45_s27 = sadd.s32 1, %s3561_s20 }
  0x59   : > { %4840 = sst [smem:[#allocation20_spill]] %s3769_s14  ;;  %s41_s15 = ssub.s32 %s3573_s23, %s3769_s14 }
  0x5a   : > { %p38_p11 = scmp.ge.s32.totalorder %s4877_s8, 2  ;;  %s69_s10 = sadd.s32 1, %s3769_s14 }
  0x5b   : > { %p54_p7 = por %p4822_p5, %p52_p3  ;;  %p3780_p9 = por %p156_p13, %p52_p3 }
  0x5c   : > { %s4879_s8 = smov (%p38_p11, %s4877_s8), 0  ;;  %s71_s9 = ssub.s32 %s33_s13, %s69_s10 }
  0x5d   : > { %s4841_s6 = scalar_select %p3780_p9, 1, 0 }
  0x5e   : > { %4843 = sst [smem:[#allocation22_spill]] %s4879_s8  ;;  %p4821_p12 = scmp.lt.s32.totalorder %s3581_s25, 4 }
  0x5f   : > { %4842 = sst [smem:[#allocation21_spill]] %s4841_s6  ;;  %s40_s7 = ssub.s32 %s3577_s24, %s4879_s8 }
  0x60   : > { %s206_s30 = sand.u32 1, %s3561_s20   ;;  %s42_s4 = sor.u32 %s41_s15, %s40_s7 }
  0x61   : > { %p43_p0 = scmp.eq.s32.totalorder %s42_s4, 0  ;;  %s72_s18 = sor.u32 %s71_s9, %s40_s7 }
  0x62   : > { %s3172_s11 = smul.u32 72, %s206_s30  ;;  %p3792_p2 = pnand %p4821_p12, %p54_p7 }
  0x63   : > { %s3797_s2 = scalar_select %p43_p0, %s3561_s20, %s45_s27  }
  0x64   : > { %s211_s3 = smul.u32 18, %s3573_s23  ;;  %s210_s6 = scalar_lea.vmem [#allocation3], %s3172_s11 }
  0x65   : > { %s3173_s14 = smul.u32 54, %s3577_s24  ;;  %s219_s13 = sshll.u32 %s210_s6, 4  ;;  %s3801_s13 = int_to_ptr.vmem [resolvable:$true] %s219_s13 }
  0x66   : > { %p3805_p4 = scmp.eq.s32.totalorder %s72_s18, 0  ;;  %s4846_s0 = sld [smem:[#allocation23_spill]] }
  0x67   : > { %s3803_s10 = sadd.s32 %s3173_s14, %s211_s3  ;;  %s3817_s11 = scalar_lea.sflag [#allocation4], %s206_s30 }
  0x68   : > { %s2541_s9 = sshll.u32 %s3803_s10, 6  ;;  %p3388_p8 = pneg %p3792_p2 }
  0x6c   : > { %s3815_s27 = scalar_lea.hbm %s4846_s0, %s2541_s9  ;;  %s3391_s18 = scalar_lea.hbm %s4846_s0, 6912 }
  0x6d   : > { %s3386_s3 = scalar_lea.hbm %s3815_s27, 1152  ;;  %p3392_p1 = scmp.lt.u32.totalorder %s3815_s27, %s4846_s0 }
  0x6e   : > { %p3387_p6 = scmp.ne.s32.totalorder %s3815_s27, %s3386_s3  ;;  %p3393_p3 = scmp.lt.u32.totalorder %s3391_s18, %s3386_s3 }
  0x6f   : > { %p3395_p7 = scmp.lt.u32.totalorder %s3386_s3, %s3815_s27 }
  0x70   : > { %p3389_p10 = pnand %p3388_p8, %p3387_p6  ;;  %p3394_p11 = por %p3393_p3, %p3392_p1 }
  0x72   : > { %p3390_p13 = pneg %p3389_p10  ;;  %p3396_p0 = por %p3395_p7, %p3394_p11 }
  0x74   : > { %p3397_p12 = pnand %p3396_p0, %p3390_p13 }
  0x76   : > { %3400 = shalt.err (!%p3397_p12)
}
  0x77   : > { %s3401_s30 = scalar_lea.vmem %s3801_s13, 1152  ;;  %s3587_s14 = smov [#allocation3]  }
  0x78   : > { %p3402_p6 = scmp.ne.s32.totalorder %s3801_s13, %s3401_s30  ;;  %s3406_s6 = sshll.u32 %s3587_s14, 4  ;;  %s3407_s6 = int_to_ptr.vmem [resolvable:$false] %s3406_s6 }
  0x79   : > { %s3408_s7 = scalar_lea.vmem %s3407_s6, 2304  ;;  %p3409_p9 = scmp.lt.s32.totalorder %s3801_s13, %s3407_s6 }
  0x7a   : > { %p3404_p10 = pnand %p3402_p6, %p3388_p8  ;;  %p3410_p1 = scmp.lt.s32.totalorder %s3408_s7, %s3401_s30 }
  0x7c   : > { %p3405_p5 = pneg %p3404_p10  ;;  %p3411_p3 = por %p3410_p1, %p3409_p9 }
  0x7e   : > { %p3412_p11 = pnand %p3411_p3, %p3405_p5 }
  0x80   : > { %3415 = shalt.err (!%p3412_p11)
}
  0x81   : > { %s4847_s3 = smov 4   ;;  %s4848_s18 = smov 64  }
  0x82   : > { %3202 = dma.hbm_to_vmem [thread:$0]  (!%p3792_p2), %s3815_s27, 1152, %s3801_s13, %s3817_s11, %s4848_s18, %s4848_s18, %s4847_s3  }
  0x83   : > { %s2445_s30 = scalar_lea.hbm %s4803_s1, %s2541_s9  ;;  %s75_s14 = sadd.s32 1, %s3549_s17 }
  0x84   : > { %s3857_s6 = scalar_select %p3805_p4, %s3549_s17, %s75_s14  }
  0x85   : > { %p82_p5 = scmp.ne.s32.totalorder %s3549_s17, %s3545_s16  ;;  %s229_s7 = sand.u32 1, %s3581_s25  }
  0x86   : > { %s231_s0 = sand.u32 1, %s3549_s17   ;;  %p4849_p9 = scmp.eq.s32.totalorder %s3581_s25, 0 }
  0x87   : > { %s3174_s8 = smul.u32 72, %s231_s0  ;;  %s3865_s24 = scalar_lea.hbm %s2445_s30, 1152 }
  0x88   : > { %p84_p12 = por %p82_p5, %p4849_p9  ;;  %p4850_p8 = scmp.lt.s32.totalorder %s3581_s25, 4 }
  0x89   : > { %s233_s10 = scalar_lea.vmem [#allocation6], %s3174_s8  ;;  %s3875_s9 = scalar_lea.sflag [#allocation7], %s229_s7 }
  0x8a   : > { %p3869_p2 = pnand %p4850_p8, %p84_p12  ;;  %s243_s15 = sshll.u32 %s233_s10, 4  ;;  %s3873_s15 = int_to_ptr.vmem [resolvable:$true] %s243_s15 }
  0x8b   : > { %s3446_s27 = scalar_lea.hbm %s2445_s30, 2304  ;;  %s3421_s4 = scalar_lea.hbm %s4803_s1, 6912 }
  0x8c   : > { %p3417_p4 = scmp.ne.s32.totalorder %s3865_s24, %s3446_s27  ;;  %p3418_p13 = pneg %p3869_p2 }
  0x8d   : > { %p3422_p6 = scmp.lt.u32.totalorder %s3865_s24, %s4803_s1  ;;  %p3423_p10 = scmp.lt.u32.totalorder %s3421_s4, %s3446_s27 }
  0x8e   : > { %p3419_p7 = pnand %p3418_p13, %p3417_p4  ;;  %p3425_p3 = scmp.lt.u32.totalorder %s3446_s27, %s3865_s24 }
  0x8f   : > { %p3424_p1 = por %p3423_p10, %p3422_p6 }
  0x90   : > { %p3420_p0 = pneg %p3419_p7 }
  0x91   : > { %p3426_p11 = por %p3425_p3, %p3424_p1 }
  0x93   : > { %p3427_p5 = pnand %p3426_p11, %p3420_p0 }
  0x95   : > { %3430 = shalt.err (!%p3427_p5)
}
  0x96   : > { %s3431_s8 = scalar_lea.vmem %s3873_s15, 1152  ;;  %s3588_s30 = smov [#allocation6]  }
  0x97   : > { %p3432_p9 = scmp.ne.s32.totalorder %s3873_s15, %s3431_s8  ;;  %s3436_s7 = sshll.u32 %s3588_s30, 4  ;;  %s3437_s7 = int_to_ptr.vmem [resolvable:$false] %s3436_s7 }
  0x98   : > { %s3438_s10 = scalar_lea.vmem %s3437_s7, 2304  ;;  %p3439_p4 = scmp.lt.s32.totalorder %s3873_s15, %s3437_s7 }
  0x99   : > { %p3434_p12 = pnand %p3432_p9, %p3418_p13  ;;  %p3440_p7 = scmp.lt.s32.totalorder %s3438_s10, %s3431_s8 }
  0x9b   : > { %p3435_p8 = pneg %p3434_p12  ;;  %p3441_p6 = por %p3440_p7, %p3439_p4 }
  0x9d   : > { %p3442_p10 = pnand %p3441_p6, %p3435_p8 }
  0x9f   : > { %3445 = shalt.err (!%p3442_p10)
}
  0xa0   : > { %3205 = dma.hbm_to_vmem [thread:$0]  (!%p3869_p2), %s3865_s24, 1152, %s3873_s15, %s3875_s9, %s4848_s18, %s4848_s18, %s4847_s3  }
  0xa1   : > { %p4852_p13 = scmp.ne.s32.totalorder %s4836_s5, 0 }
  0xa2   : > { %s3908_s27 = sand.u32 (!%p4852_p13), 1, %s3557_s19   ;;  %p4853_p0 = scmp.ne.s32.totalorder (!%p4852_p13), %s4832_s28, 0 }
  0xa3   : > { %255 = sbr.rel (%p4852_p13) target bundleno = 756 (0x2f4), region = 36  ;;  %s258_s11 = scalar_lea.sflag (!%p4852_p13), [#allocation4], %s3908_s27 }
  0xa4   : > { %s3175_s0 = smul.u32 (!%p4852_p13), 72, %s3908_s27 }
  0xa6   : > { %s3914_s13 = scalar_lea.vmem (!%p4852_p13), [#allocation3], %s3175_s0 }
  0xaa   : > { %3520 = dma.done.wait (%p4853_p0), %s258_s11, 1152  }
  0xab   : > { %3522 = vsyncadd (%p4853_p0), %s258_s11, 4294966144  ;;  %s266_s24 = sand.u32 1, %s3673_s26   ;;  %s268_s5 = sand.u32 1, %s3545_s16  }
  0xac   : > { %s3176_s3 = smul.u32 72, %s268_s5  ;;  %s267_s18 = scalar_lea.sflag [#allocation7], %s266_s24 }
  0xad   : > { %p4854_p2 = scmp.ne.s32.totalorder %s4833_s29, 0 }
  0xae   : > { %s3922_s15 = scalar_lea.vmem [#allocation6], %s3176_s3 }
  0xaf   : > { %3524 = dma.done.wait (%p4854_p2), %s267_s18, 1152  }
  0xb0   : > { %3526 = vsyncadd (%p4854_p2), %s267_s18, 4294966144  ;;  %p4855_p1 = scmp.eq.s32.totalorder %s3673_s26, 0 }
  0xb2   : > { %3528 = dma.done.wait (%p4855_p1), [#allocation7], 576   ;;  %p4856_p3 = pmov %p4855_p1 }
  0xb3   : > { %p4857_p11 = pmov %p4855_p1 }
  0xb4   : > { %3530 = vsyncadd (%p4856_p3), [#allocation7], 4294966720 }
  0xb5   : > { %3532 = dma.done.wait (%p4857_p11), [#allocation10], 16   ;;  %p4858_p5 = pmov %p4855_p1 }
  0xb6   : > { %v3589_v0 = vmov 0.0   ;;  %vm3590_vm0 = vmmov 0   ;;  %vm593_vm1 = vcmask 1043456   ;;  %vm385_vm2 = vcmask 64512   ;;  %v488_v1 = vld [vmem:[#allocation8 + $0x4] sm:$0xf] }
  0xb7   : > { %3534 = vsyncadd (%p4858_p5), [#allocation10], 4294967280  ;;  %2828 = vmatprep.subr.bf16.mxu0 %v3589_v0  ;;  %3170 = vmatprep.subr.bf16.mxu1 %v3589_v0  ;;  %v595_v2 = vsel %vm593_vm1, %v488_v1, 0  ;;  %v3318_v3 = vld [vmem:[%s3914_s13] sm:$0xff]   ;;  %v3319_v4 = vld [vmem:[%s3914_s13 + $0x8] sm:$0xff]   ;;  %vm841_vm4 = vcmask 1046528  }
  0xb8   : > { %2830 = vmatprep.mubr.msk.bf16.mxu0 %vm3590_vm0, %v3589_v0  ;;  %2850 = vmatprep.mubr.msk.bf16.mxu1 %vm3590_vm0, %v3589_v0  ;;  %386 = vst.msk [vmem:[#allocation2] sm:$0xff] %vm385_vm2, %v3318_v3  ;;  %v3320_v5 = vld [vmem:[%s3914_s13 + $0x28] sm:$0xff]   ;;  %387 = vst.msk [vmem:[#allocation2 + $0x8] sm:$0xff] %vm385_vm2, %v3319_v4  ;;  %v3321_v6 = vld [vmem:[%s3914_s13 + $0x30] sm:$0xff]   ;;  %vm489_vm3 = vsmask.f32 7424 }
  0xb9   : > { %2829 = vmatpush3.bf16.msra.mxu0 %v595_v2  ;;  %3171 = vmatpush3.bf16.msra.mxu1 %v595_v2  ;;  %391 = vst.msk [vmem:[#allocation2 + $0x28] sm:$0xff] %vm385_vm2, %v3320_v5  ;;  %392 = vst.msk [vmem:[#allocation2 + $0x30] sm:$0xff] %vm385_vm2, %v3321_v6  ;;  %v3322_v7 = vld [vmem:[%s3914_s13 + $0x10] sm:$0xff]   ;;  %v3323_v8 = vld [vmem:[%s3914_s13 + $0x38] sm:$0xff]   ;;  %vm1211_vm5 = vsmask.f32 6400 }
  0xba   : > { %2904 = vmatprep.subr.bf16.mxu0 %v3589_v0  ;;  %2866 = vmatprep.subr.bf16.mxu1 %v3589_v0  ;;  %388 = vst.msk [vmem:[#allocation2 + $0x10] sm:$0xff] %vm385_vm2, %v3322_v7  ;;  %v3324_v9 = vld [vmem:[%s3914_s13 + $0x18] sm:$0xff]   ;;  %393 = vst.msk [vmem:[#allocation2 + $0x38] sm:$0xff] %vm385_vm2, %v3323_v8  ;;  %v3325_v10 = vld [vmem:[%s3914_s13 + $0x40] sm:$0xff]   ;;  %vm1459_vm6 = vcmask 1045504   ;;  %vm2077_vm8 = vcmask 1044480  }
  0xbb   : > { %389 = vst.msk [vmem:[#allocation2 + $0x18] sm:$0xff] %vm385_vm2, %v3324_v9  ;;  %v3326_v12 = vld [vmem:[%s3914_s13 + $0x20] sm:$0xff]   ;;  %394 = vst.msk [vmem:[#allocation2 + $0x40] sm:$0xff] %vm385_vm2, %v3325_v10  ;;  %v3327_v16 = vld [vmem:[%s3922_s15] sm:$0xff]   ;;  %vm1829_vm7 = vsmask.f32 5376 }
  0xbc   : > { %390 = vst.msk [vmem:[#allocation2 + $0x20] sm:$0xff] %vm385_vm2, %v3326_v12  ;;  %v830_v23 = vld [vmem:[#allocation8 + $0x8] sm:$0xf]  ;;  %467 = vst.msk [vmem:[#allocation2 + $0x48] sm:$0xff] %vm385_vm2, %v3327_v16  ;;  %v485_v28 = vld [vmem:[#allocation8] sm:$0xf] }
  0xbd   : > { %v889_v32 = vsel %vm593_vm1, %v830_v23, 0  ;;  %v721_v39 = vsel %vm593_vm1, %v485_v28, 0  ;;  %v3328_v28 = vld [vmem:[%s3922_s15 + $0x8] sm:$0xff]   ;;  %s4690_s26 = scalar_lea.vmem [#allocation11], %s3175_s0  ;;  %s2391_s28 = smul.u32 18, %s3565_s21 }
  0xbe   : > { %468 = vst.msk [vmem:[#allocation2 + $0x50] sm:$0xff] %vm385_vm2, %v3328_v28  ;;  %s3177_s29 = smul.u32 36, %s3569_s22  ;;  %s4859_s9 = sld [smem:[#allocation21_spill]] }
  0xbf   : > { %v3959_v11 = vld [vmem:[#allocation2] sm:$0xff]  ;;  %v3963_v13 = vld [vmem:[#allocation2 + $0x8] sm:$0xff]  ;;  %s2399_s21 = sshll.u32 %s4690_s26, 4  ;;  %s4860_s8 = sld [smem:[#allocation26_spill]]  ;;  %s4733_s21 = int_to_ptr.vmem [resolvable:$true] %s2399_s21 }
  0xc0   : > { %v491_v14 = vshrl.u32 %v3959_v11, 16  ;;  %v493_v15 = vshll.u32 %v3959_v11, 16  ;;  %v498_v17 = vshll.u32 %v3963_v13, 16  ;;  %v3970_v18 = vld [vmem:[#allocation2 + $0x28] sm:$0xff]  ;;  %v3973_v20 = vld [vmem:[#allocation2 + $0x30] sm:$0xff]  ;;  %v502_v30 = vshrl.u32 %v3963_v13, 16  ;;  %s2396_s4 = sadd.s32 %s3177_s29, %s2391_s28 }
  0xc1   : > { %v3976_v21 = vshll.u32 %v3970_v18, 16  ;;  %v3979_v22 = vshrl.u32 %v3970_v18, 16  ;;  %v3983_v25 = vshll.u32 %v3973_v20, 16  ;;  %v3986_v29 = vld [vmem:[#allocation2 + $0x10] sm:$0xff]  ;;  %v3992_v34 = vld [vmem:[#allocation2 + $0x38] sm:$0xff]  ;;  %v3999_v37 = vshrl.u32 %v3973_v20, 16 }
  0xc2   : > { %v495_v19 = vrot.slane %v493_v15, 1  ;;  %v500_v24 = vrot.slane %v498_v17, 1  ;;  %v506_v33 = vshll.u32 %v3986_v29, 16  ;;  %v4002_v38 = vshll.u32 %v3992_v34, 16  ;;  %v4010_v43 = vld [vmem:[#allocation2 + $0x18] sm:$0xff]  ;;  %v4017_v46 = vld [vmem:[#allocation2 + $0x40] sm:$0xff] }
  0xc3   : > { %v532_v27 = vrot.slane %v3976_v21, 1  ;;  %v540_v31 = vrot.slane %v3983_v25, 1  ;;  %v510_v48 = vshrl.u32 %v3986_v29, 16  ;;  %v4023_v49 = vshll.u32 %v4010_v43, 16  ;;  %v486_v53 = vld [vmem:[#allocation2 + $0x48] sm:$0x1] }
  0xc4   : > { %v496_v26 = vor.u32 %v495_v19, %v491_v14  ;;  %v504_v41 = vor.u32 %v502_v30, %v500_v24  ;;  %v508_v42 = vrot.slane %v506_v33, 1  ;;  %v548_v45 = vrot.slane %v4002_v38, 1  ;;  %v4040_v58 = vld [vmem:[#allocation2 + $0x20] sm:$0xff]  ;;  %v4084_v19 = vld [vmem:[#allocation2 + $0x48] sm:$0xff]  ;;  %s2664_s12 = sshll.u32 %s2396_s4, 6  ;;  %s2384_s7 = scalar_lea.sflag [#allocation5], %s3908_s27 }
  0xc5   : > { %v536_v36 = vor.u32 %v3979_v22, %v532_v27  ;;  %v544_v44 = vor.u32 %v3999_v37, %v540_v31  ;;  %v4027_v51 = vshrl.u32 %v3992_v34, 16  ;;  %v4030_v52 = vshll.u32 %v4017_v46, 16  ;;  %v828_v30 = vld [vmem:[#allocation2] sm:$0xfe]  ;;  %s4738_s30 = scalar_lea.hbm %s4860_s8, %s2664_s12  ;;  %s3447_s10 = scalar_lea.vmem %s4733_s21, 1152 }
  0xc6   : > { %v501_v35 = vsel %vm489_vm3, %v496_v26, %v500_v24  ;;  %v509_v47 = vsel %vm489_vm3, %v504_v41, %v508_v42  ;;  %v512_v54 = vor.u32 %v510_v48, %v508_v42  ;;  %v516_v55 = vrot.slane %v4023_v49, 1  ;;  %v1025_v26 = vld [vmem:[#allocation8 + $0xc] sm:$0xf]  ;;  %p3448_p9 = scmp.ne.s32.totalorder %s4733_s21, %s3447_s10  ;;  %p4861_p12 = scmp.ne.s32.totalorder %s4859_s9, 0 }
  0xc7   : > { %2831 = vmatmul.mubr.msk.bf16.vlgmr.msra.gmra.mrb[0].mxu0 %vm385_vm2, %v501_v35  ;;  %v541_v40 = vsel %vm489_vm3, %v536_v36, %v540_v31  ;;  %v549_v50 = vsel %vm489_vm3, %v544_v44, %v548_v45  ;;  %v4037_v56 = vrot.slane %v4017_v46, 1  ;;  %v859_v57 = vrot.slane %v486_v53, 1  ;;  %v1210_v35 = vld [vmem:[#allocation8 + $0x10] sm:$0xf]  ;;  %s3591_s0 = smov [#allocation11]  }
  0xc8   : > { %2905 = vmatpush3.bf16.msra.mxu0 %v889_v32  ;;  %2834 = vmatprep.mubr.msk.bf16.mxu0 %vm3590_vm0, %v3589_v0  ;;  %v552_v59 = vor.u32 %v4027_v51, %v548_v45  ;;  %v556_v60 = vrot.slane %v4030_v52, 1  ;;  %v1223_v62 = vrot.slane %v510_v48, 1  ;;  %v1226_v63 = vrot.slane %v506_v33, 2  ;;  %p3449_p8 = pnand %p3448_p9, %p4861_p12  ;;  %s3451_s11 = sshll.u32 %s3591_s0, 4  ;;  %s3452_s11 = int_to_ptr.vmem [resolvable:$false] %s3451_s11 }
  0xc9   : > { %2851 = vmatmul.mubr.msk.bf16.vlgmr.msra.gmra.mrb[0].mxu1 %vm385_vm2, %v541_v40  ;;  %2980 = vmatprep.subr.bf16.mxu0 %v3589_v0  ;;  %v4048_v61 = vsel %vm841_vm4, %v4037_v56, %v859_v57  ;;  %v517_v1 = vsel %vm489_vm3, %v512_v54, %v516_v55  ;;  %v4052_v2 = vshrl.u32 %v4010_v43, 16  ;;  %v4055_v3 = vshll.u32 %v4040_v58, 16  ;;  %v1014_v57 = vld [vmem:[#allocation2 + $0x8] sm:$0xfe]  ;;  %s3453_s13 = scalar_lea.vmem %s3452_s11, 2304  ;;  %p3454_p7 = scmp.lt.s32.totalorder %s4733_s21, %s3452_s11 }
  0xca   : > { %2867 = vmatpush3.bf16.msra.mxu1 %v721_v39  ;;  %2854 = vmatprep.mubr.msk.bf16.mxu1 %vm3590_vm0, %v3589_v0  ;;  %v4057_v4 = vor.u32 %v1226_v63, %v1223_v62  ;;  %v557_v5 = vsel %vm489_vm3, %v552_v59, %v556_v60  ;;  %v4061_v6 = vshrl.u32 %v4017_v46, 16  ;;  %v562_v7 = vshll.u32 %v486_v53, 16  ;;  %v1456_v63 = vld [vmem:[#allocation8 + $0x14] sm:$0xf]  ;;  %p3450_p4 = pneg %p3449_p8  ;;  %p3455_p6 = scmp.lt.s32.totalorder %s3453_s13, %s3447_s10 }
  0xcb   : > { %2942 = vmatprep.subr.bf16.mxu1 %v3589_v0  ;;  %v520_v8 = vor.u32 %v4052_v2, %v516_v55  ;;  %v524_v9 = vrot.slane %v4055_v3, 1  ;;  %v4074_v15 = vshrl.u32 %v4040_v58, 16  ;;  %v1051_v23 = vrot.slane %v4084_v19, 1 }
  0xcc   : > { %v560_v10 = vor.u32 %v4061_v6, %v556_v60  ;;  %v564_v12 = vrot.slane %v562_v7, 1  ;;  %v1083_v32 = vsel %vm593_vm1, %v1025_v26, 0  ;;  %v842_v33 = vrot.slane %v828_v30, 1  ;;  %p3456_p10 = por %p3455_p6, %p3454_p7 }
  0xcd   : > { %v525_v14 = vsel %vm489_vm3, %v520_v8, %v524_v9  ;;  %v528_v17 = vor.u32 %v4074_v15, %v524_v9  ;;  %v4095_v31 = vsel %vm841_vm4, %v4037_v56, %v1051_v23  ;;  %v1329_v39 = vsel %vm593_vm1, %v1210_v35, 0  ;;  %v1643_v9 = vld [vmem:[#allocation8 + $0x18] sm:$0xf] }
  0xce   : > { %v565_v16 = vsel %vm489_vm3, %v560_v10, %v564_v12  ;;  %v845_v40 = vrot.slane %v3986_v29, 1  ;;  %v847_v41 = vrot.slane %v4010_v43, 1  ;;  %v849_v42 = vrot.slane %v4040_v58, 1  ;;  %p3457_p13 = pnand %p3456_p10, %p3450_p4 }
  0xcf   : > { %2835 = vmatmul.mubr.msk.bf16.gmra.mrb[4].mxu0 %vm385_vm2, %v509_v47  ;;  %v533_v24 = vsel %vm489_vm3, %v528_v17, %v532_v27  ;;  %v843_v27 = vrot.slane %v3963_v13, 1  ;;  %v851_v45 = vrot.slane %v3970_v18, 1  ;;  %v853_v48 = vrot.slane %v3973_v20, 1 }
  0xd0   : > { %2838 = vmatprep.mubr.msk.bf16.mxu0 %vm3590_vm0, %v3589_v0  ;;  %v4138_v44 = vsel %vm841_vm4, %v847_v41, %v849_v42  ;;  %v855_v53 = vrot.slane %v3992_v34, 1  ;;  %v1213_v59 = vshrl.u32 %v1014_v57, 16  ;;  %v1216_v60 = vshll.u32 %v1014_v57, 16 }
  0xd1   : > { %2855 = vmatmul.mubr.msk.bf16.gmra.mrb[4].mxu1 %vm385_vm2, %v549_v50  ;;  %v844_v36 = vsel %vm841_vm4, %v842_v33, %v843_v27  ;;  %v4150_v47 = vsel %vm841_vm4, %v849_v42, %v851_v45  ;;  %v4162_v50 = vsel %vm841_vm4, %v851_v45, %v853_v48  ;;  %v1036_v62 = vrot.slane %v1014_v57, 1 }
  0xd2   : > { %2858 = vmatprep.mubr.msk.bf16.mxu1 %vm3590_vm0, %v3589_v0  ;;  %v4174_v54 = vsel %vm841_vm4, %v853_v48, %v855_v53  ;;  %v4186_v55 = vsel %vm841_vm4, %v855_v53, %v4037_v56  ;;  %v1218_v56 = vrot.slane %v1216_v60, 2  ;;  %v1507_v7 = vsel %vm593_vm1, %v1456_v63, 0  ;;  %v4278_v60 = vld [vmem:[#allocation2 + $0x50] sm:$0x3] }
  0xd3   : > { %v1235_v12 = vrot.slane %v4023_v49, 2  ;;  %v1241_v26 = vrot.slane %v4074_v15, 1  ;;  %v1244_v28 = vrot.slane %v4055_v3, 2  ;;  %v1253_v33 = vrot.slane %v3976_v21, 2 }
  0xd4   : > { %v1277_v45 = vrot.slane %v4061_v6, 1  ;;  %v1287_v53 = vshll.u32 %v4084_v19, 16  ;;  %v1293_v63 = vshrl.u32 %v4278_v60, 16 }
  0xd5   : > { %v1245_v30 = vor.u32 %v1244_v28, %v1241_v26  ;;  %v1463_v26 = vrot.slane %v4010_v43, 2 }
  0xd7   : > { %2839 = vmatmul.mubr.msk.bf16.gmra.mrb[8].mxu0 %vm385_vm2, %v517_v1  ;;  %v1215_v1 = vrot.slane %v1213_v59, 1  ;;  %v1289_v59 = vrot.slane %v1287_v53, 2 }
  0xd8   : > { %2842 = vmatprep.mubr.msk.bf16.mxu0 %vm3590_vm0, %v3589_v0 }
  0xd9   : > { %2859 = vmatmul.mubr.msk.bf16.gmra.mrb[8].mxu1 %vm385_vm2, %v557_v5  ;;  %v1038_v5 = vsel %vm841_vm4, %v1036_v62, %v845_v40  ;;  %v1219_v8 = vor.u32 %v1218_v56, %v1215_v1  ;;  %v1023_v62 = vld [vmem:[#allocation2 + $0x50] sm:$0x1]  ;;  %v1296_v1 = vshll.u32 %v4278_v60, 16 }
  0xda   : > { %2862 = vmatprep.mubr.msk.bf16.mxu1 %vm3590_vm0, %v3589_v0  ;;  %v1053_v56 = vrot.slane %v1023_v62, 1 }
  0xdb   : > { %v1228_v10 = vsel %vm1211_vm5, %v1219_v8, %v4057_v4  ;;  %v1298_v8 = vrot.slane %v1296_v1, 2 }
  0xdf   : > { %2843 = vmatmul.mubr.msk.bf16.gmra.mrb[12].mxu0 %vm385_vm2, %v525_v14  ;;  %v3329_v14 = vld [vmem:[%s3922_s15 + $0x10] sm:$0xff]  }
  0xe0   : > { %2846 = vmatprep.mubr.msk.bf16.mxu0 %vm3590_vm0, %v3589_v0  ;;  %469 = vst.msk [vmem:[#allocation2 + $0x58] sm:$0xff] %vm385_vm2, %v3329_v14 }
  0xe1   : > { %2863 = vmatmul.mubr.msk.bf16.gmra.mrb[12].mxu1 %vm385_vm2, %v565_v16  ;;  %v1701_v16 = vsel %vm593_vm1, %v1643_v9, 0  ;;  %v1054_v9 = vsel %vm841_vm4, %v1051_v23, %v1053_v56  ;;  %v4301_v23 = vld [vmem:[#allocation2 + $0x10] sm:$0xfc] }
  0xe2   : > { %2868 = vmatprep.mubr.msk.bf16.mxu1 %vm3590_vm0, %v3589_v0  ;;  %v1654_v28 = vrot.slane %v4301_v23, 2 }
  0xe7   : > { %2847 = vmatmul.mubr.msk.bf16.gmra.mrb[16].mxu0 %vm385_vm2, %v533_v24 }
  0xe8   : > { %2906 = vmatprep.mubr.msk.bf16.mxu0 %vm3590_vm0, %v3589_v0 }
  0xe9   : > { %2869 = vmatmul.mubr.msk.bf16.vlgmr.msra.gmra.mrb[16].mxu1 %vm385_vm2, %v3959_v11  ;;  %v846_v11 = vsel %vm841_vm4, %v843_v27, %v845_v40 }
  0xea   : > { %2943 = vmatpush3.bf16.msra.mxu1 %v1083_v32  ;;  %2872 = vmatprep.mubr.msk.bf16.mxu1 %vm3590_vm0, %v3589_v0 }
  0xeb   : > { %3018 = vmatprep.subr.bf16.mxu1 %v3589_v0 }
  0xef   : > { %2907 = vmatmul.mubr.msk.bf16.vlgmr.msra.gmra.mrb[20].mxu0 %vm385_vm2, %v844_v36  ;;  %v1259_v36 = vrot.slane %v3999_v37, 1 }
  0xf0   : > { %2981 = vmatpush3.bf16.msra.mxu0 %v1329_v39  ;;  %2910 = vmatprep.mubr.msk.bf16.mxu0 %vm3590_vm0, %v3589_v0  ;;  %v1262_v39 = vrot.slane %v3983_v25, 2 }
  0xf1   : > { %2873 = vmatmul.mubr.msk.bf16.gmra.mrb[20].mxu1 %vm385_vm2, %v3963_v13  ;;  %3056 = vmatprep.subr.bf16.mxu0 %v3589_v0  ;;  %v848_v13 = vsel %vm841_vm4, %v845_v40, %v847_v41  ;;  %v1268_v41 = vrot.slane %v4027_v51, 1 }
  0xf2   : > { %2876 = vmatprep.mubr.msk.bf16.mxu1 %vm3590_vm0, %v3589_v0  ;;  %v1263_v40 = vor.u32 %v1262_v39, %v1259_v36  ;;  %v1469_v39 = vrot.slane %v3973_v20, 2 }
  0xf7   : > { %2911 = vmatmul.mubr.msk.bf16.gmra.mrb[24].mxu0 %vm385_vm2, %v846_v11 }
  0xf8   : > { %2914 = vmatprep.mubr.msk.bf16.mxu0 %vm3590_vm0, %v3589_v0 }
  0xf9   : > { %2877 = vmatmul.mubr.msk.bf16.gmra.mrb[24].mxu1 %vm385_vm2, %v3986_v29 }
  0xfa   : > { %2880 = vmatprep.mubr.msk.bf16.mxu1 %vm3590_vm0, %v3589_v0 }
  0xff   : > { %2915 = vmatmul.mubr.msk.bf16.gmra.mrb[28].mxu0 %vm385_vm2, %v848_v13 }
 0x100   : > { %2918 = vmatprep.mubr.msk.bf16.mxu0 %vm3590_vm0, %v3589_v0 }
 0x101   : > { %2881 = vmatmul.mubr.msk.bf16.gmra.mrb[28].mxu1 %vm385_vm2, %v4010_v43 }
 0x102   : > { %2884 = vmatprep.mubr.msk.bf16.mxu1 %vm3590_vm0, %v3589_v0 }
 0x107   : > { %2919 = vmatmul.mubr.msk.bf16.gmra.mrb[32].mxu0 %vm385_vm2, %v4138_v44 }
 0x108   : > { %2922 = vmatprep.mubr.msk.bf16.mxu0 %vm3590_vm0, %v3589_v0 }
 0x109   : > { %2885 = vmatmul.mubr.msk.bf16.gmra.mrb[32].mxu1 %vm385_vm2, %v4040_v58 }
 0x10a   : > { %2888 = vmatprep.mubr.msk.bf16.mxu1 %vm3590_vm0, %v3589_v0 }
 0x10f   : > { %2923 = vmatmul.mubr.msk.bf16.gmra.mrb[36].mxu0 %vm385_vm2, %v4150_v47 }
 0x110   : > { %2926 = vmatprep.mubr.msk.bf16.mxu0 %vm3590_vm0, %v3589_v0 }
 0x111   : > { %2889 = vmatmul.mubr.msk.bf16.gmra.mrb[36].mxu1 %vm385_vm2, %v3970_v18 }
 0x112   : > { %2892 = vmatprep.mubr.msk.bf16.mxu1 %vm3590_vm0, %v3589_v0 }
 0x117   : > { %2927 = vmatmul.mubr.msk.bf16.gmra.mrb[40].mxu0 %vm385_vm2, %v4162_v50 }
 0x118   : > { %2930 = vmatprep.mubr.msk.bf16.mxu0 %vm3590_vm0, %v3589_v0 }
 0x119   : > { %2893 = vmatmul.mubr.msk.bf16.gmra.mrb[40].mxu1 %vm385_vm2, %v3973_v20 }
 0x11a   : > { %2896 = vmatprep.mubr.msk.bf16.mxu1 %vm3590_vm0, %v3589_v0 }
 0x11f   : > { %2931 = vmatmul.mubr.msk.bf16.gmra.mrb[44].mxu0 %vm385_vm2, %v4174_v54 }
 0x120   : > { %2934 = vmatprep.mubr.msk.bf16.mxu0 %vm3590_vm0, %v3589_v0 }
 0x121   : > { %2897 = vmatmul.mubr.msk.bf16.gmra.mrb[44].mxu1 %vm385_vm2, %v3992_v34 }
 0x122   : > { %2900 = vmatprep.mubr.msk.bf16.mxu1 %vm3590_vm0, %v3589_v0 }
 0x127   : > { %2935 = vmatmul.mubr.msk.bf16.gmra.mrb[48].mxu0 %vm385_vm2, %v4186_v55 }
 0x128   : > { %2938 = vmatprep.mubr.msk.bf16.mxu0 %vm3590_vm0, %v3589_v0 }
 0x129   : > { %2901 = vmatmul.mubr.msk.bf16.gmra.mrb[48].mxu1 %vm385_vm2, %v4017_v46 }
 0x12a   : > { %2944 = vmatprep.mubr.msk.bf16.mxu1 %vm3590_vm0, %v3589_v0 }
 0x12f   : > { %2939 = vmatmul.mubr.msk.bf16.gmra.mrb[52].mxu0 %vm385_vm2, %v4048_v61  ;;  %v1232_v61 = vrot.slane %v4052_v2, 1 }
 0x130   : > { %2982 = vmatprep.mubr.msk.bf16.mxu0 %vm3590_vm0, %v3589_v0 }
 0x131   : > { %2945 = vmatmul.mubr.msk.bf16.vlgmr.msra.gmra.mrb[52].mxu1 %vm385_vm2, %v1038_v5  ;;  %v1236_v17 = vor.u32 %v1235_v12, %v1232_v61  ;;  %v1461_v12 = vrot.slane %v3986_v29, 2  ;;  %v2074_v29 = vld [vmem:[#allocation8 + $0x20] sm:$0xf] }
 0x132   : > { %3019 = vmatpush3.bf16.msra.mxu1 %v1507_v7  ;;  %2948 = vmatprep.mubr.msk.bf16.mxu1 %vm3590_vm0, %v3589_v0  ;;  %v1295_v7 = vrot.slane %v1293_v63, 1 }
 0x133   : > { %3094 = vmatprep.subr.bf16.mxu1 %v3589_v0  ;;  %v1237_v24 = vsel %vm1211_vm5, %v4057_v4, %v1236_v17  ;;  %v1246_v32 = vsel %vm1211_vm5, %v1236_v17, %v1245_v30  ;;  %v1250_v4 = vrot.slane %v3979_v22, 1 }
 0x134   : > { %v1299_v61 = vor.u32 %v1298_v8, %v1295_v7 }
 0x135   : > { %v1254_v27 = vor.u32 %v1253_v33, %v1250_v4  ;;  %v1464_v4 = vsel %vm1459_vm6, %v1461_v12, %v1463_v26  ;;  %v1465_v33 = vrot.slane %v4040_v58, 2 }
 0x137   : > { %2983 = vmatmul.mubr.msk.bf16.vlgmr.msra.gmra.mrb[56].mxu0 %vm385_vm2, %v1228_v10  ;;  %v1255_v35 = vsel %vm1211_vm5, %v1245_v30, %v1254_v27  ;;  %v1264_v11 = vsel %vm1211_vm5, %v1254_v27, %v1263_v40  ;;  %v1454_v10 = vld [vmem:[#allocation2 + $0x8] sm:$0xfc]  ;;  %v1656_v30 = vsel %vm1459_vm6, %v1654_v28, %v1463_v26  ;;  %v1466_v27 = vsel %vm1459_vm6, %v1463_v26, %v1465_v33  ;;  %v4386_v26 = vld [vmem:[#allocation2 + $0x50] sm:$0xff] }
 0x138   : > { %3057 = vmatpush3.bf16.msra.mxu0 %v1701_v16  ;;  %2986 = vmatprep.mubr.msk.bf16.mxu0 %vm3590_vm0, %v3589_v0  ;;  %v1828_v16 = vld [vmem:[#allocation8 + $0x1c] sm:$0xf] }
 0x139   : > { %2949 = vmatmul.mubr.msk.bf16.gmra.mrb[56].mxu1 %vm385_vm2, %v848_v13  ;;  %3132 = vmatprep.subr.bf16.mxu0 %v3589_v0  ;;  %v1271_v13 = vrot.slane %v4002_v38, 2 }
 0x13a   : > { %2952 = vmatprep.mubr.msk.bf16.mxu1 %vm3590_vm0, %v3589_v0 }
 0x13b   : > { %v1272_v42 = vor.u32 %v1271_v13, %v1268_v41 }
 0x13f   : > { %2987 = vmatmul.mubr.msk.bf16.gmra.mrb[60].mxu0 %vm385_vm2, %v1237_v24  ;;  %v1947_v24 = vsel %vm593_vm1, %v1828_v16, 0 }
 0x140   : > { %2990 = vmatprep.mubr.msk.bf16.mxu0 %vm3590_vm0, %v3589_v0 }
 0x141   : > { %2953 = vmatmul.mubr.msk.bf16.gmra.mrb[60].mxu1 %vm385_vm2, %v4138_v44  ;;  %v1273_v44 = vsel %vm1211_vm5, %v1263_v40, %v1272_v42 }
 0x142   : > { %2956 = vmatprep.mubr.msk.bf16.mxu1 %vm3590_vm0, %v3589_v0 }
 0x147   : > { %2991 = vmatmul.mubr.msk.bf16.gmra.mrb[64].mxu0 %vm385_vm2, %v1246_v32  ;;  %v2125_v32 = vsel %vm593_vm1, %v2074_v29, 0 }
 0x148   : > { %2994 = vmatprep.mubr.msk.bf16.mxu0 %vm3590_vm0, %v3589_v0 }
 0x149   : > { %2957 = vmatmul.mubr.msk.bf16.gmra.mrb[64].mxu1 %vm385_vm2, %v4150_v47  ;;  %v1280_v47 = vrot.slane %v4030_v52, 2 }
 0x14a   : > { %2960 = vmatprep.mubr.msk.bf16.mxu1 %vm3590_vm0, %v3589_v0 }
 0x14b   : > { %v1281_v48 = vor.u32 %v1280_v47, %v1277_v45 }
 0x14f   : > { %2995 = vmatmul.mubr.msk.bf16.gmra.mrb[68].mxu0 %vm385_vm2, %v1255_v35  ;;  %v1467_v35 = vrot.slane %v3970_v18, 2 }
 0x150   : > { %2998 = vmatprep.mubr.msk.bf16.mxu0 %vm3590_vm0, %v3589_v0 }
 0x151   : > { %2961 = vmatmul.mubr.msk.bf16.gmra.mrb[68].mxu1 %vm385_vm2, %v4162_v50  ;;  %v1284_v50 = vshrl.u32 %v4084_v19, 16  ;;  %v1468_v36 = vsel %vm1459_vm6, %v1465_v33, %v1467_v35  ;;  %v1470_v40 = vsel %vm1459_vm6, %v1467_v35, %v1469_v39  ;;  %v1831_v33 = vshrl.u32 %v4301_v23, 16 }
 0x152   : > { %2964 = vmatprep.mubr.msk.bf16.mxu1 %vm3590_vm0, %v3589_v0 }
 0x153   : > { %v1286_v57 = vrot.slane %v1284_v50, 1 }
 0x157   : > { %2999 = vmatmul.mubr.msk.bf16.gmra.mrb[72].mxu0 %vm385_vm2, %v1264_v11  ;;  %v1471_v11 = vrot.slane %v3992_v34, 2 }
 0x158   : > { %3002 = vmatprep.mubr.msk.bf16.mxu0 %vm3590_vm0, %v3589_v0 }
 0x159   : > { %2965 = vmatmul.mubr.msk.bf16.gmra.mrb[72].mxu1 %vm385_vm2, %v4174_v54  ;;  %v1282_v54 = vsel %vm1211_vm5, %v1272_v42, %v1281_v48  ;;  %v1472_v45 = vsel %vm1459_vm6, %v1469_v39, %v1471_v11 }
 0x15a   : > { %2968 = vmatprep.mubr.msk.bf16.mxu1 %vm3590_vm0, %v3589_v0 }
 0x15f   : > { %3003 = vmatmul.mubr.msk.bf16.gmra.mrb[76].mxu0 %vm385_vm2, %v1273_v44 }
 0x160   : > { %3006 = vmatprep.mubr.msk.bf16.mxu0 %vm3590_vm0, %v3589_v0 }
 0x161   : > { %2969 = vmatmul.mubr.msk.bf16.gmra.mrb[76].mxu1 %vm385_vm2, %v4186_v55  ;;  %v1290_v55 = vor.u32 %v1289_v59, %v1286_v57  ;;  %v1473_v59 = vrot.slane %v4017_v46, 2 }
 0x162   : > { %2972 = vmatprep.mubr.msk.bf16.mxu1 %vm3590_vm0, %v3589_v0 }
 0x163   : > { %v1291_v5 = vsel %vm1211_vm5, %v1281_v48, %v1290_v55  ;;  %v1300_v14 = vsel %vm1211_vm5, %v1290_v55, %v1299_v61  ;;  %v1474_v56 = vsel %vm1459_vm6, %v1471_v11, %v1473_v59 }
 0x167   : > { %3007 = vmatmul.mubr.msk.bf16.gmra.mrb[80].mxu0 %vm385_vm2, %v1282_v54 }
 0x168   : > { %3010 = vmatprep.mubr.msk.bf16.mxu0 %vm3590_vm0, %v3589_v0 }
 0x169   : > { %2973 = vmatmul.mubr.msk.bf16.gmra.mrb[80].mxu1 %vm385_vm2, %v4095_v31  ;;  %v1460_v31 = vrot.slane %v1454_v10, 2  ;;  %v1475_v10 = vrot.slane %v4084_v19, 2 }
 0x16a   : > { %2976 = vmatprep.mubr.msk.bf16.mxu1 %vm3590_vm0, %v3589_v0 }
 0x16b   : > { %v1462_v17 = vsel %vm1459_vm6, %v1460_v31, %v1461_v12  ;;  %v1476_v16 = vsel %vm1459_vm6, %v1473_v59, %v1475_v10  ;;  %v1841_v59 = vrot.slane %v4052_v2, 2 }
 0x16f   : > { %3011 = vmatmul.mubr.msk.bf16.gmra.mrb[84].mxu0 %vm385_vm2, %v1291_v5 }
 0x170   : > { %3014 = vmatprep.mubr.msk.bf16.mxu0 %vm3590_vm0, %v3589_v0 }
 0x171   : > { %2977 = vmatmul.mubr.msk.bf16.gmra.mrb[84].mxu1 %vm385_vm2, %v1054_v9 }
 0x172   : > { %3020 = vmatprep.mubr.msk.bf16.mxu1 %vm3590_vm0, %v3589_v0 }
 0x177   : > { %3015 = vmatmul.mubr.msk.bf16.gmra.mrb[88].mxu0 %vm385_vm2, %v1300_v14 }
 0x178   : > { %3058 = vmatprep.mubr.msk.bf16.mxu0 %vm3590_vm0, %v3589_v0 }
 0x179   : > { %3021 = vmatmul.mubr.msk.bf16.vlgmr.msra.gmra.mrb[88].mxu1 %vm385_vm2, %v1462_v17 }
 0x17a   : > { %3095 = vmatpush3.bf16.msra.mxu1 %v1947_v24  ;;  %3024 = vmatprep.mubr.msk.bf16.mxu1 %vm3590_vm0, %v3589_v0 }
 0x17f   : > { %3059 = vmatmul.mubr.msk.bf16.vlgmr.msra.gmra.mrb[92].mxu0 %vm385_vm2, %v1656_v30  ;;  %v1669_v30 = vrot.slane %v4386_v26, 2 }
 0x180   : > { %3133 = vmatpush3.bf16.msra.mxu0 %v2125_v32  ;;  %3062 = vmatprep.mubr.msk.bf16.mxu0 %vm3590_vm0, %v3589_v0  ;;  %v1477_v32 = vrot.slane %v4278_v60, 2 }
 0x181   : > { %3025 = vmatmul.mubr.msk.bf16.gmra.mrb[92].mxu1 %vm385_vm2, %v1464_v4 }
 0x182   : > { %3028 = vmatprep.mubr.msk.bf16.mxu1 %vm3590_vm0, %v3589_v0  ;;  %v1478_v60 = vsel %vm1459_vm6, %v1475_v10, %v1477_v32 }
 0x187   : > { %3063 = vmatmul.mubr.msk.bf16.gmra.mrb[96].mxu0 %vm385_vm2, %v1466_v27 }
 0x188   : > { %3066 = vmatprep.mubr.msk.bf16.mxu0 %vm3590_vm0, %v3589_v0 }
 0x189   : > { %3029 = vmatmul.mubr.msk.bf16.gmra.mrb[96].mxu1 %vm385_vm2, %v1466_v27  ;;  %v1834_v27 = vshll.u32 %v4301_v23, 16  ;;  %v1844_v23 = vrot.slane %v4023_v49, 3 }
 0x18a   : > { %3032 = vmatprep.mubr.msk.bf16.mxu1 %vm3590_vm0, %v3589_v0 }
 0x18f   : > { %3067 = vmatmul.mubr.msk.bf16.gmra.mrb[100].mxu0 %vm385_vm2, %v1468_v36 }
 0x190   : > { %3070 = vmatprep.mubr.msk.bf16.mxu0 %vm3590_vm0, %v3589_v0 }
 0x191   : > { %3033 = vmatmul.mubr.msk.bf16.gmra.mrb[100].mxu1 %vm385_vm2, %v1468_v36 }
 0x192   : > { %3036 = vmatprep.mubr.msk.bf16.mxu1 %vm3590_vm0, %v3589_v0 }
 0x197   : > { %3071 = vmatmul.mubr.msk.bf16.gmra.mrb[104].mxu0 %vm385_vm2, %v1470_v40 }
 0x198   : > { %3074 = vmatprep.mubr.msk.bf16.mxu0 %vm3590_vm0, %v3589_v0 }
 0x199   : > { %3037 = vmatmul.mubr.msk.bf16.gmra.mrb[104].mxu1 %vm385_vm2, %v1470_v40  ;;  %v1670_v40 = vsel %vm1459_vm6, %v1475_v10, %v1669_v30 }
 0x19a   : > { %v4345_v41 = vpop.f32.mrb[0].mxu0  ;;  %3040 = vmatprep.mubr.msk.bf16.mxu1 %vm3590_vm0, %v3589_v0 }
 0x19b   : > { %v2832_v13 = vpop.f32.mrb[1].mxu0 }
 0x19c   : > { %v4349_v42 = vpop.f32.mrb[2].mxu0  ;;  %v4351_v44 = vpop.f32.mrb[0].mxu1 }
 0x19d   : > { %v2833_v47 = vpop.f32.mrb[3].mxu0  ;;  %v2852_v48 = vpop.f32.mrb[1].mxu1 }
 0x19e   : > { %v4354_v54 = vpop.f32.mrb[2].mxu1  ;;  %v1833_v48 = vrot.slane %v1831_v33, 2 }
 0x19f   : > { %3075 = vmatmul.mubr.msk.bf16.gmra.mrb[108].mxu0 %vm385_vm2, %v1472_v45  ;;  %v2853_v57 = vpop.f32.mrb[3].mxu1 }
 0x1a0   : > { %3078 = vmatprep.mubr.msk.bf16.mxu0 %vm3590_vm0, %v3589_v0  ;;  %v1836_v57 = vrot.slane %v1834_v27, 3  ;;  %v1850_v27 = vrot.slane %v4074_v15, 2 }
 0x1a1   : > { %3041 = vmatmul.mubr.msk.bf16.gmra.mrb[108].mxu1 %vm385_vm2, %v1472_v45  ;;  %v1641_v45 = vld [vmem:[#allocation2 + $0x58] sm:$0x3] }
 0x1a2   : > { %v4361_v62 = vpop.f32.mrb[4].mxu0  ;;  %3044 = vmatprep.mubr.msk.bf16.mxu1 %vm3590_vm0, %v3589_v0 }
 0x1a3   : > { %v2836_v55 = vpop.f32.mrb[5].mxu0 }
 0x1a4   : > { %v4365_v63 = vpop.f32.mrb[6].mxu0  ;;  %v4367_v1 = vpop.f32.mrb[4].mxu1 }
 0x1a5   : > { %v2837_v5 = vpop.f32.mrb[7].mxu0  ;;  %v2856_v7 = vpop.f32.mrb[5].mxu1 }
 0x1a6   : > { %v4370_v8 = vpop.f32.mrb[6].mxu1  ;;  %v1837_v7 = vor.u32 %v1836_v57, %v1833_v48 }
 0x1a7   : > { %3079 = vmatmul.mubr.msk.bf16.gmra.mrb[112].mxu0 %vm385_vm2, %v1474_v56  ;;  %v2857_v9 = vpop.f32.mrb[7].mxu1 }
 0x1a8   : > { %3082 = vmatprep.mubr.msk.bf16.mxu0 %vm3590_vm0, %v3589_v0  ;;  %v1845_v9 = vor.u32 %v1844_v23, %v1841_v59 }
 0x1a9   : > { %3045 = vmatmul.mubr.msk.bf16.gmra.mrb[112].mxu1 %vm385_vm2, %v1474_v56  ;;  %v1671_v56 = vrot.slane %v1641_v45, 2 }
 0x1aa   : > { %v4377_v61 = vpop.f32.mrb[8].mxu0  ;;  %3048 = vmatprep.mubr.msk.bf16.mxu1 %vm3590_vm0, %v3589_v0  ;;  %v1846_v33 = vsel %vm1829_vm7, %v1837_v7, %v1845_v9  ;;  %v1859_v7 = vrot.slane %v3979_v22, 2 }
 0x1ab   : > { %v2840_v31 = vpop.f32.mrb[9].mxu0 }
 0x1ac   : > { %v4381_v12 = vpop.f32.mrb[10].mxu0  ;;  %v4383_v14 = vpop.f32.mrb[8].mxu1  ;;  %v1672_v31 = vsel %vm1459_vm6, %v1669_v30, %v1671_v56 }
 0x1ad   : > { %v2841_v17 = vpop.f32.mrb[11].mxu0  ;;  %v2860_v24 = vpop.f32.mrb[9].mxu1 }
 0x1ae   : > { %v4388_v28 = vpop.f32.mrb[10].mxu1 }
 0x1af   : > { %3083 = vmatmul.mubr.msk.bf16.gmra.mrb[116].mxu0 %vm385_vm2, %v1476_v16  ;;  %v2861_v29 = vpop.f32.mrb[11].mxu1 }
 0x1b0   : > { %3086 = vmatprep.mubr.msk.bf16.mxu0 %vm3590_vm0, %v3589_v0  ;;  %v2072_v29 = vld [vmem:[#allocation2 + $0x10] sm:$0xf8] }
 0x1b1   : > { %3049 = vmatmul.mubr.msk.bf16.gmra.mrb[116].mxu1 %vm385_vm2, %v1476_v16  ;;  %v2078_v30 = vrot.slane %v2072_v29, 3 }
 0x1b2   : > { %v4396_v4 = vpop.f32.mrb[12].mxu0  ;;  %3052 = vmatprep.mubr.msk.bf16.mxu1 %vm3590_vm0, %v3589_v0 }
 0x1b3   : > { %v2844_v35 = vpop.f32.mrb[13].mxu0 }
 0x1b4   : > { %v4402_v36 = vpop.f32.mrb[14].mxu0  ;;  %v4404_v39 = vpop.f32.mrb[12].mxu1  ;;  %v1853_v35 = vrot.slane %v4055_v3, 3 }
 0x1b5   : > { %v2845_v11 = vpop.f32.mrb[15].mxu0  ;;  %v2864_v13 = vpop.f32.mrb[13].mxu1 }
 0x1b6   : > { %v4408_v47 = vpop.f32.mrb[14].mxu1  ;;  %v1854_v15 = vor.u32 %v1853_v35, %v1850_v27 }
 0x1b7   : > { %3087 = vmatmul.mubr.msk.bf16.gmra.mrb[120].mxu0 %vm385_vm2, %v1670_v40  ;;  %v2865_v55 = vpop.f32.mrb[15].mxu1 }
 0x1b8   : > { %3090 = vmatprep.mubr.msk.bf16.mxu0 %vm3590_vm0, %v3589_v0  ;;  %v1855_v56 = vsel %vm1829_vm7, %v1845_v9, %v1854_v15 }
 0x1b9   : > { %3053 = vmatmul.mubr.msk.bf16.gmra.mrb[120].mxu1 %vm385_vm2, %v1478_v60 }
 0x1ba   : > { %v4416_v5 = vpop.f32.mrb[16].mxu0  ;;  %3096 = vmatprep.mubr.msk.bf16.mxu1 %vm3590_vm0, %v3589_v0 }
 0x1bb   : > { %v2848_v10 = vpop.f32.mrb[17].mxu0 }
 0x1bc   : > { %v757_v2 = vpop.f32.mrb[16].mxu1  ;;  %v4420_v49 = vpop.f32.mrb[18].mxu0  ;;  %v1862_v10 = vrot.slane %v3976_v21, 3 }
 0x1bd   : > { %v758_v16 = vadd.f32 %v757_v2, %v4345_v41  ;;  %v2870_v17 = vpop.f32.mrb[17].mxu1  ;;  %v2849_v24 = vpop.f32.mrb[19].mxu0  ;;  %v2079_v41 = vrot.slane %v4010_v43, 3 }
 0x1be   : > { %v760_v32 = vpop.f32.mrb[18].mxu1  ;;  %v1863_v9 = vor.u32 %v1862_v10, %v1859_v7 }
 0x1bf   : > { %v761_v40 = vadd.f32 %v760_v32, %v4349_v42  ;;  %3091 = vmatmul.mubr.msk.bf16.gmra.mrb[124].mxu0 %vm385_vm2, %v1672_v31  ;;  %v2871_v11 = vpop.f32.mrb[19].mxu1  ;;  %v2080_v48 = vsel %vm2077_vm8, %v2078_v30, %v2079_v41 }
 0x1c0   : > { %3134 = vmatprep.mubr.msk.bf16.mxu0 %vm3590_vm0, %v3589_v0  ;;  %v1864_v35 = vsel %vm1829_vm7, %v1854_v15, %v1863_v9  ;;  %v1871_v11 = vrot.slane %v3983_v25, 3 }
 0x1c1   : > { %3097 = vmatmul.mubr.msk.bf16.vlgmr.msra.gmra.mrb[124].mxu1 %vm385_vm2, %v1846_v33 }
 0x1c2   : > { %v925_v13 = vpop.f32.mrb[20].mxu0  ;;  %3100 = vmatprep.mubr.msk.bf16.mxu1 %vm3590_vm0, %v3589_v0 }
 0x1c3   : > { %v4435_v3 = vadd.f32 %v925_v13, %v758_v16  ;;  %v2908_v42 = vpop.f32.mrb[21].mxu0 }
 0x1c4   : > { %v765_v60 = vpop.f32.mrb[20].mxu1  ;;  %v928_v45 = vpop.f32.mrb[22].mxu0 }
 0x1c5   : > { %v766_v57 = vadd.f32 %v765_v60, %v4361_v62  ;;  %v2874_v59 = vpop.f32.mrb[21].mxu1  ;;  %v4439_v23 = vadd.f32 %v928_v45, %v761_v40  ;;  %v2909_v43 = vpop.f32.mrb[23].mxu0  ;;  %v2081_v62 = vrot.slane %v4040_v58, 3  ;;  %v1868_v40 = vrot.slane %v3999_v37, 2 }
 0x1c6   : > { %v768_v55 = vpop.f32.mrb[22].mxu1 }
 0x1c7   : > { %v769_v2 = vadd.f32 %v768_v55, %v4365_v63  ;;  %3135 = vmatmul.mubr.msk.bf16.vlgmr.msra.gmra.mrb[128].mxu0 %vm385_vm2, %v2080_v48  ;;  %v2875_v31 = vpop.f32.mrb[23].mxu1  ;;  %v2082_v24 = vsel %vm2077_vm8, %v2079_v41, %v2081_v62  ;;  %v1872_v15 = vor.u32 %v1871_v11, %v1868_v40  ;;  %v1877_v55 = vrot.slane %v4027_v51, 2 }
 0x1c8   : > { %3138 = vmatprep.mubr.msk.bf16.mxu0 %vm3590_vm0, %v3589_v0 }
 0x1c9   : > { %3101 = vmatmul.mubr.msk.bf16.gmra.mrb[128].mxu1 %vm385_vm2, %v1855_v56  ;;  %v1873_v43 = vsel %vm1829_vm7, %v1863_v9, %v1872_v15  ;;  %v1880_v56 = vrot.slane %v4002_v38, 3 }
 0x1ca   : > { %v933_v16 = vpop.f32.mrb[24].mxu0  ;;  %3104 = vmatprep.mubr.msk.bf16.mxu1 %vm3590_vm0, %v3589_v0 }
 0x1cb   : > { %v4452_v22 = vadd.f32 %v933_v16, %v766_v57  ;;  %v2912_v21 = vpop.f32.mrb[25].mxu0  ;;  %v1881_v31 = vor.u32 %v1880_v56, %v1877_v55 }
 0x1cc   : > { %v773_v17 = vpop.f32.mrb[24].mxu1  ;;  %v936_v63 = vpop.f32.mrb[26].mxu0 }
 0x1cd   : > { %v774_v29 = vadd.f32 %v773_v17, %v4377_v61  ;;  %v2878_v32 = vpop.f32.mrb[25].mxu1  ;;  %v4456_v33 = vadd.f32 %v936_v63, %v769_v2  ;;  %v2913_v58 = vpop.f32.mrb[27].mxu0  ;;  %v2083_v61 = vrot.slane %v3970_v18, 3 }
 0x1ce   : > { %v776_v27 = vpop.f32.mrb[26].mxu1  ;;  %v1889_v32 = vrot.slane %v4030_v52, 3 }
 0x1cf   : > { %v777_v30 = vadd.f32 %v776_v27, %v4381_v12  ;;  %3139 = vmatmul.mubr.msk.bf16.gmra.mrb[132].mxu0 %vm385_vm2, %v2082_v24  ;;  %v2879_v13 = vpop.f32.mrb[27].mxu1  ;;  %v2084_v60 = vsel %vm2077_vm8, %v2081_v62, %v2083_v61  ;;  %v1882_v24 = vsel %vm1829_vm7, %v1872_v15, %v1881_v31 }
 0x1d0   : > { %3142 = vmatprep.mubr.msk.bf16.mxu0 %vm3590_vm0, %v3589_v0 }
 0x1d1   : > { %3105 = vmatmul.mubr.msk.bf16.gmra.mrb[132].mxu1 %vm385_vm2, %v1864_v35 }
 0x1d2   : > { %v941_v41 = vpop.f32.mrb[28].mxu0  ;;  %3108 = vmatprep.mubr.msk.bf16.mxu1 %vm3590_vm0, %v3589_v0 }
 0x1d3   : > { %v4469_v37 = vadd.f32 %v941_v41, %v774_v29  ;;  %v2916_v25 = vpop.f32.mrb[29].mxu0  ;;  %v1886_v29 = vrot.slane %v4061_v6, 2 }
 0x1d4   : > { %v781_v42 = vpop.f32.mrb[28].mxu1  ;;  %v944_v12 = vpop.f32.mrb[30].mxu0 }
 0x1d5   : > { %v782_v45 = vadd.f32 %v781_v42, %v4396_v4  ;;  %v2882_v48 = vpop.f32.mrb[29].mxu1  ;;  %v4473_v57 = vadd.f32 %v944_v12, %v777_v30  ;;  %v2917_v18 = vpop.f32.mrb[31].mxu0  ;;  %v2085_v4 = vrot.slane %v3973_v20, 3  ;;  %v1890_v40 = vor.u32 %v1889_v32, %v1886_v29 }
 0x1d6   : > { %v784_v59 = vpop.f32.mrb[30].mxu1  ;;  %v1895_v42 = vrot.slane %v1284_v50, 2  ;;  %v1898_v12 = vrot.slane %v1287_v53, 3  ;;  %v1902_v18 = vshrl.u32 %v4386_v26, 16  ;;  %v1905_v53 = vshll.u32 %v4386_v26, 16 }
 0x1d7   : > { %v785_v7 = vadd.f32 %v784_v59, %v4402_v36  ;;  %3143 = vmatmul.mubr.msk.bf16.gmra.mrb[136].mxu0 %vm385_vm2, %v2084_v60  ;;  %v2883_v10 = vpop.f32.mrb[31].mxu1  ;;  %v2086_v16 = vsel %vm2077_vm8, %v2083_v61, %v2085_v4  ;;  %v1891_v25 = vsel %vm1829_vm7, %v1881_v31, %v1890_v40 }
 0x1d8   : > { %3146 = vmatprep.mubr.msk.bf16.mxu0 %vm3590_vm0, %v3589_v0  ;;  %v1899_v50 = vor.u32 %v1898_v12, %v1895_v42 }
 0x1d9   : > { %3109 = vmatmul.mubr.msk.bf16.gmra.mrb[136].mxu1 %vm385_vm2, %v1873_v43 }
 0x1da   : > { %v949_v2 = vpop.f32.mrb[32].mxu0  ;;  %3112 = vmatprep.mubr.msk.bf16.mxu1 %vm3590_vm0, %v3589_v0  ;;  %v1900_v31 = vsel %vm1829_vm7, %v1890_v40, %v1899_v50 }
 0x1db   : > { %v4486_v51 = vadd.f32 %v949_v2, %v782_v45  ;;  %v2920_v38 = vpop.f32.mrb[33].mxu0 }
 0x1dc   : > { %v789_v62 = vpop.f32.mrb[32].mxu1  ;;  %v952_v36 = vpop.f32.mrb[34].mxu0  ;;  %v1904_v38 = vrot.slane %v1902_v18, 2 }
 0x1dd   : > { %v790_v9 = vadd.f32 %v789_v62, %v4416_v5  ;;  %v2886_v21 = vpop.f32.mrb[33].mxu1  ;;  %v4490_v17 = vadd.f32 %v952_v36, %v785_v7  ;;  %v2921_v20 = vpop.f32.mrb[35].mxu0  ;;  %v2087_v5 = vrot.slane %v3992_v34, 3  ;;  %v1907_v62 = vrot.slane %v1905_v53, 3 }
 0x1de   : > { %v792_v63 = vpop.f32.mrb[34].mxu1 }
 0x1df   : > { %v793_v58 = vadd.f32 %v792_v63, %v4420_v49  ;;  %3147 = vmatmul.mubr.msk.bf16.gmra.mrb[140].mxu0 %vm385_vm2, %v2086_v16  ;;  %v2887_v27 = vpop.f32.mrb[35].mxu1  ;;  %v2088_v30 = vsel %vm2077_vm8, %v2085_v4, %v2087_v5  ;;  %v1908_v20 = vor.u32 %v1907_v62, %v1904_v38 }
 0x1e0   : > { %3150 = vmatprep.mubr.msk.bf16.mxu0 %vm3590_vm0, %v3589_v0 }
 0x1e1   : > { %3113 = vmatmul.mubr.msk.bf16.gmra.mrb[140].mxu1 %vm385_vm2, %v1882_v24 }
 0x1e2   : > { %v957_v35 = vpop.f32.mrb[36].mxu0  ;;  %3116 = vmatprep.mubr.msk.bf16.mxu1 %vm3590_vm0, %v3589_v0 }
 0x1e3   : > { %v4503_v6 = vadd.f32 %v957_v35, %v790_v9  ;;  %v2924_v52 = vpop.f32.mrb[37].mxu0  ;;  %v1826_v9 = vld [vmem:[#allocation2 + $0x58] sm:$0x7] }
 0x1e4   : > { %v797_v11 = vpop.f32.mrb[36].mxu1  ;;  %v960_v49 = vpop.f32.mrb[38].mxu0  ;;  %v1911_v63 = vshrl.u32 %v1826_v9, 16  ;;  %v1914_v24 = vshll.u32 %v1826_v9, 16 }
 0x1e5   : > { %v798_v13 = vadd.f32 %v797_v11, %v4351_v44  ;;  %v2890_v61 = vpop.f32.mrb[37].mxu1  ;;  %v4507_v41 = vadd.f32 %v960_v49, %v793_v58  ;;  %v2925_v34 = vpop.f32.mrb[39].mxu0  ;;  %v2089_v44 = vrot.slane %v4017_v46, 3  ;;  %v1909_v11 = vsel %vm1829_vm7, %v1899_v50, %v1908_v20 }
 0x1e6   : > { %v800_v15 = vpop.f32.mrb[38].mxu1  ;;  %v1913_v49 = vrot.slane %v1911_v63, 2  ;;  %v2093_v34 = vrot.slane %v4386_v26, 3 }
 0x1e7   : > { %v801_v60 = vadd.f32 %v800_v15, %v4354_v54  ;;  %3151 = vmatmul.mubr.msk.bf16.gmra.mrb[144].mxu0 %vm385_vm2, %v2088_v30  ;;  %v2891_v45 = vpop.f32.mrb[39].mxu1  ;;  %v2090_v56 = vsel %vm2077_vm8, %v2087_v5, %v2089_v44  ;;  %v1916_v30 = vrot.slane %v1914_v24, 3 }
 0x1e8   : > { %3154 = vmatprep.mubr.msk.bf16.mxu0 %vm3590_vm0, %v3589_v0 }
 0x1e9   : > { %3117 = vmatmul.mubr.msk.bf16.gmra.mrb[144].mxu1 %vm385_vm2, %v1891_v25  ;;  %v1917_v15 = vor.u32 %v1916_v30, %v1913_v49 }
 0x1ea   : > { %v965_v48 = vpop.f32.mrb[40].mxu0  ;;  %3120 = vmatprep.mubr.msk.bf16.mxu1 %vm3590_vm0, %v3589_v0 }
 0x1eb   : > { %v4524_v54 = vadd.f32 %v965_v48, %v798_v13  ;;  %v2928_v59 = vpop.f32.mrb[41].mxu0  ;;  %v1918_v18 = vsel %vm1829_vm7, %v1908_v20, %v1917_v15 }
 0x1ec   : > { %v805_v43 = vpop.f32.mrb[40].mxu1  ;;  %v968_v55 = vpop.f32.mrb[42].mxu0 }
 0x1ed   : > { %v806_v46 = vadd.f32 %v805_v43, %v4367_v1  ;;  %v2894_v7 = vpop.f32.mrb[41].mxu1  ;;  %v4528_v10 = vadd.f32 %v968_v55, %v801_v60  ;;  %v2929_v4 = vpop.f32.mrb[43].mxu0  ;;  %v2091_v1 = vrot.slane %v4084_v19, 3  ;;  %v2095_v43 = vrot.slane %v1826_v9, 3 }
 0x1ee   : > { %v808_v2 = vpop.f32.mrb[42].mxu1 }
 0x1ef   : > { %v809_v36 = vadd.f32 %v808_v2, %v4370_v8  ;;  %3155 = vmatmul.mubr.msk.bf16.gmra.mrb[148].mxu0 %vm385_vm2, %v2090_v56  ;;  %v2895_v16 = vpop.f32.mrb[43].mxu1  ;;  %v2092_v27 = vsel %vm2077_vm8, %v2089_v44, %v2091_v1  ;;  %v2094_v60 = vsel %vm2077_vm8, %v2091_v1, %v2093_v34  ;;  %v2096_v4 = vsel %vm2077_vm8, %v2093_v34, %v2095_v43 }
 0x1f0   : > { %3158 = vmatprep.mubr.msk.bf16.mxu0 %vm3590_vm0, %v3589_v0 }
 0x1f1   : > { %3121 = vmatmul.mubr.msk.bf16.gmra.mrb[148].mxu1 %vm385_vm2, %v1900_v31 }
 0x1f2   : > { %v973_v21 = vpop.f32.mrb[44].mxu0  ;;  %3124 = vmatprep.mubr.msk.bf16.mxu1 %vm3590_vm0, %v3589_v0 }
 0x1f3   : > { %v4539_v29 = vadd.f32 %v973_v21, %v806_v46  ;;  %v2932_v8 = vpop.f32.mrb[45].mxu0 }
 0x1f4   : > { %v813_v32 = vpop.f32.mrb[44].mxu1  ;;  %v976_v58 = vpop.f32.mrb[46].mxu0 }
 0x1f5   : > { %v814_v5 = vadd.f32 %v813_v32, %v4383_v14  ;;  %v2898_v35 = vpop.f32.mrb[45].mxu1  ;;  %v4543_v19 = vadd.f32 %v976_v58, %v809_v36  ;;  %v2933_v40 = vpop.f32.mrb[47].mxu0 }
 0x1f6   : > { %v816_v52 = vpop.f32.mrb[46].mxu1 }
 0x1f7   : > { %v817_v13 = vadd.f32 %v816_v52, %v4388_v28  ;;  %3159 = vmatmul.mubr.msk.bf16.gmra.mrb[152].mxu0 %vm385_vm2, %v2092_v27  ;;  %v2899_v61 = vpop.f32.mrb[47].mxu1 }
 0x1f8   : > { %3162 = vmatprep.mubr.msk.bf16.mxu0 %vm3590_vm0, %v3589_v0 }
 0x1f9   : > { %3125 = vmatmul.mubr.msk.bf16.gmra.mrb[152].mxu1 %vm385_vm2, %v1909_v11 }
 0x1fa   : > { %v981_v14 = vpop.f32.mrb[48].mxu0  ;;  %3128 = vmatprep.mubr.msk.bf16.mxu1 %vm3590_vm0, %v3589_v0 }
 0x1fb   : > { %v4554_v25 = vadd.f32 %v981_v14, %v814_v5  ;;  %v2936_v42 = vpop.f32.mrb[49].mxu0 }
 0x1fc   : > { %v821_v12 = vpop.f32.mrb[48].mxu1  ;;  %v984_v28 = vpop.f32.mrb[50].mxu0 }
 0x1fd   : > { %v822_v45 = vadd.f32 %v821_v12, %v4404_v39  ;;  %v2902_v44 = vpop.f32.mrb[49].mxu1  ;;  %v4558_v48 = vadd.f32 %v984_v28, %v817_v13  ;;  %v2937_v26 = vpop.f32.mrb[51].mxu0 }
 0x1fe   : > { %v824_v50 = vpop.f32.mrb[50].mxu1 }
 0x1ff   : > { %v825_v53 = vadd.f32 %v824_v50, %v4408_v47  ;;  %3163 = vmatmul.mubr.msk.bf16.gmra.mrb[156].mxu0 %vm385_vm2, %v2094_v60  ;;  %v2903_v59 = vpop.f32.mrb[51].mxu1 }
 0x200   : > { %3166 = vmatprep.mubr.msk.bf16.mxu0 %vm3590_vm0, %v3589_v0 }
 0x201   : > { %3129 = vmatmul.mubr.msk.bf16.gmra.mrb[156].mxu1 %vm385_vm2, %v1918_v18 }
 0x202   : > { %v989_v55 = vpop.f32.mrb[52].mxu0 }
 0x203   : > { %v4566_v39 = vadd.f32 %v989_v55, %v822_v45  ;;  %v2940_v56 = vpop.f32.mrb[53].mxu0 }
 0x204   : > { %v1119_v46 = vpop.f32.mrb[52].mxu1  ;;  %v992_v7 = vpop.f32.mrb[54].mxu0 }
 0x205   : > { %v1190_v2 = vadd.f32 %v1119_v46, %v4435_v3  ;;  %v2946_v47 = vpop.f32.mrb[53].mxu1  ;;  %v4570_v31 = vadd.f32 %v992_v7, %v825_v53  ;;  %v2941_v38 = vpop.f32.mrb[55].mxu0 }
 0x206   : > { %v1122_v62 = vpop.f32.mrb[54].mxu1 }
 0x207   : > { %v1191_v0 = vadd.f32 %v1122_v62, %v4439_v23  ;;  %3167 = vmatmul.mubr.msk.bf16.gmra.mrb[160].mxu0 %vm385_vm2, %v2096_v4  ;;  %v2947_v36 = vpop.f32.mrb[55].mxu1 }
 0x20a   : > { %v1365_v16 = vpop.f32.mrb[56].mxu0 }
 0x20b   : > { %v4574_v9 = vadd.f32 %v1365_v16, %v1190_v2  ;;  %v2984_v1 = vpop.f32.mrb[57].mxu0 }
 0x20c   : > { %v1127_v21 = vpop.f32.mrb[56].mxu1  ;;  %v1368_v20 = vpop.f32.mrb[58].mxu0 }
 0x20d   : > { %v1192_v63 = vadd.f32 %v1127_v21, %v4452_v22  ;;  %v2950_v24 = vpop.f32.mrb[57].mxu1  ;;  %v4577_v3 = vadd.f32 %v1368_v20, %v1191_v0  ;;  %v2985_v8 = vpop.f32.mrb[59].mxu0 }
 0x20e   : > { %v1130_v32 = vpop.f32.mrb[58].mxu1 }
 0x20f   : > { %v1193_v58 = vadd.f32 %v1130_v32, %v4456_v33  ;;  %v2951_v27 = vpop.f32.mrb[59].mxu1 }
 0x212   : > { %v1373_v23 = vpop.f32.mrb[60].mxu0 }
 0x213   : > { %v4580_v5 = vadd.f32 %v1373_v23, %v1192_v63  ;;  %v2988_v35 = vpop.f32.mrb[61].mxu0 }
 0x214   : > { %v1135_v40 = vpop.f32.mrb[60].mxu1  ;;  %v1376_v52 = vpop.f32.mrb[62].mxu0 }
 0x215   : > { %v1194_v11 = vadd.f32 %v1135_v40, %v4469_v37  ;;  %v2954_v49 = vpop.f32.mrb[61].mxu1  ;;  %v4583_v30 = vadd.f32 %v1376_v52, %v1193_v58  ;;  %v2989_v22 = vpop.f32.mrb[63].mxu0 }
 0x216   : > { %v1138_v13 = vpop.f32.mrb[62].mxu1 }
 0x217   : > { %v1195_v61 = vadd.f32 %v1138_v13, %v4473_v57  ;;  %v2955_v34 = vpop.f32.mrb[63].mxu1 }
 0x21a   : > { %v1381_v14 = vpop.f32.mrb[64].mxu0 }
 0x21b   : > { %v4586_v15 = vadd.f32 %v1381_v14, %v1194_v11  ;;  %v2992_v33 = vpop.f32.mrb[65].mxu0 }
 0x21c   : > { %v1143_v42 = vpop.f32.mrb[64].mxu1  ;;  %v1384_v12 = vpop.f32.mrb[66].mxu0 }
 0x21d   : > { %v1196_v28 = vadd.f32 %v1143_v42, %v4486_v51  ;;  %v2958_v60 = vpop.f32.mrb[65].mxu1  ;;  %v4589_v45 = vadd.f32 %v1384_v12, %v1195_v61  ;;  %v2993_v37 = vpop.f32.mrb[67].mxu0 }
 0x21e   : > { %v1146_v44 = vpop.f32.mrb[66].mxu1 }
 0x21f   : > { %v1197_v26 = vadd.f32 %v1146_v44, %v4490_v17  ;;  %v2959_v50 = vpop.f32.mrb[67].mxu1 }
 0x222   : > { %v1389_v18 = vpop.f32.mrb[68].mxu0 }
 0x223   : > { %v4592_v53 = vadd.f32 %v1389_v18, %v1196_v28  ;;  %v2996_v57 = vpop.f32.mrb[69].mxu0 }
 0x224   : > { %v1151_v59 = vpop.f32.mrb[68].mxu1  ;;  %v1392_v43 = vpop.f32.mrb[70].mxu0 }
 0x225   : > { %v1198_v55 = vadd.f32 %v1151_v59, %v4503_v6  ;;  %v2962_v56 = vpop.f32.mrb[69].mxu1  ;;  %v4595_v46 = vadd.f32 %v1392_v43, %v1197_v26  ;;  %v2997_v51 = vpop.f32.mrb[71].mxu0 }
 0x226   : > { %v1154_v7 = vpop.f32.mrb[70].mxu1 }
 0x227   : > { %v1199_v4 = vadd.f32 %v1154_v7, %v4507_v41  ;;  %v2963_v2 = vpop.f32.mrb[71].mxu1 }
 0x22a   : > { %v1397_v47 = vpop.f32.mrb[72].mxu0 }
 0x22b   : > { %v4598_v38 = vadd.f32 %v1397_v47, %v1198_v55  ;;  %v3000_v17 = vpop.f32.mrb[73].mxu0 }
 0x22c   : > { %v1159_v62 = vpop.f32.mrb[72].mxu1  ;;  %v1400_v0 = vpop.f32.mrb[74].mxu0 }
 0x22d   : > { %v1200_v36 = vadd.f32 %v1159_v62, %v4524_v54  ;;  %v2966_v16 = vpop.f32.mrb[73].mxu1  ;;  %v4601_v1 = vadd.f32 %v1400_v0, %v1199_v4  ;;  %v3001_v6 = vpop.f32.mrb[75].mxu0 }
 0x22e   : > { %v1162_v21 = vpop.f32.mrb[74].mxu1 }
 0x22f   : > { %v1201_v20 = vadd.f32 %v1162_v21, %v4528_v10  ;;  %v2967_v63 = vpop.f32.mrb[75].mxu1 }
 0x232   : > { %v1405_v24 = vpop.f32.mrb[76].mxu0 }
 0x233   : > { %v4604_v8 = vadd.f32 %v1405_v24, %v1200_v36  ;;  %v3004_v41 = vpop.f32.mrb[77].mxu0 }
 0x234   : > { %v1167_v32 = vpop.f32.mrb[76].mxu1  ;;  %v1408_v58 = vpop.f32.mrb[78].mxu0 }
 0x235   : > { %v1202_v27 = vadd.f32 %v1167_v32, %v4539_v29  ;;  %v2970_v23 = vpop.f32.mrb[77].mxu1  ;;  %v4607_v35 = vadd.f32 %v1408_v58, %v1201_v20  ;;  %v3005_v54 = vpop.f32.mrb[79].mxu0 }
 0x236   : > { %v1170_v40 = vpop.f32.mrb[78].mxu1 }
 0x237   : > { %v1203_v52 = vadd.f32 %v1170_v40, %v4543_v19  ;;  %v2971_v11 = vpop.f32.mrb[79].mxu1 }
 0x23a   : > { %v1413_v49 = vpop.f32.mrb[80].mxu0 }
 0x23b   : > { %v4610_v22 = vadd.f32 %v1413_v49, %v1202_v27  ;;  %v3008_v10 = vpop.f32.mrb[81].mxu0 }
 0x23c   : > { %v1175_v13 = vpop.f32.mrb[80].mxu1  ;;  %v1416_v61 = vpop.f32.mrb[82].mxu0 }
 0x23d   : > { %v1204_v34 = vadd.f32 %v1175_v13, %v4554_v25  ;;  %v2974_v14 = vpop.f32.mrb[81].mxu1  ;;  %v4613_v33 = vadd.f32 %v1416_v61, %v1203_v52  ;;  %v3009_v29 = vpop.f32.mrb[83].mxu0 }
 0x23e   : > { %v1178_v42 = vpop.f32.mrb[82].mxu1 }
 0x23f   : > { %v1205_v12 = vadd.f32 %v1178_v42, %v4558_v48  ;;  %v2975_v28 = vpop.f32.mrb[83].mxu1 }
 0x242   : > { %v1421_v60 = vpop.f32.mrb[84].mxu0 }
 0x243   : > { %v4616_v37 = vadd.f32 %v1421_v60, %v1204_v34  ;;  %v3012_v19 = vpop.f32.mrb[85].mxu0 }
 0x244   : > { %v1183_v44 = vpop.f32.mrb[84].mxu1  ;;  %v1424_v26 = vpop.f32.mrb[86].mxu0 }
 0x245   : > { %v1206_v50 = vadd.f32 %v1183_v44, %v4566_v39  ;;  %v2978_v18 = vpop.f32.mrb[85].mxu1  ;;  %v4619_v57 = vadd.f32 %v1424_v26, %v1205_v12  ;;  %v3013_v25 = vpop.f32.mrb[87].mxu0 }
 0x246   : > { %v1186_v59 = vpop.f32.mrb[86].mxu1 }
 0x247   : > { %v1207_v43 = vadd.f32 %v1186_v59, %v4570_v31  ;;  %v2979_v55 = vpop.f32.mrb[87].mxu1 }
 0x24a   : > { %v1429_v56 = vpop.f32.mrb[88].mxu0 }
 0x24b   : > { %v4622_v51 = vadd.f32 %v1429_v56, %v1206_v50  ;;  %v3016_v48 = vpop.f32.mrb[89].mxu0 }
 0x24c   : > { %v1543_v7 = vpop.f32.mrb[88].mxu1  ;;  %v1432_v4 = vpop.f32.mrb[90].mxu0 }
 0x24d   : > { %v1614_v2 = vadd.f32 %v1543_v7, %v4574_v9  ;;  %v3022_v47 = vpop.f32.mrb[89].mxu1  ;;  %v4625_v17 = vadd.f32 %v1432_v4, %v1207_v43  ;;  %v3017_v39 = vpop.f32.mrb[91].mxu0 }
 0x24e   : > { %v1546_v62 = vpop.f32.mrb[90].mxu1 }
 0x24f   : > { %v1615_v0 = vadd.f32 %v1546_v62, %v4577_v3  ;;  %v3023_v36 = vpop.f32.mrb[91].mxu1 }
 0x252   : > { %v1737_v16 = vpop.f32.mrb[92].mxu0 }
 0x253   : > { %v4628_v6 = vadd.f32 %v1737_v16, %v1614_v2  ;;  %v3060_v31 = vpop.f32.mrb[93].mxu0 }
 0x254   : > { %v1551_v21 = vpop.f32.mrb[92].mxu1  ;;  %v1740_v20 = vpop.f32.mrb[94].mxu0 }
 0x255   : > { %v1616_v63 = vadd.f32 %v1551_v21, %v4580_v5  ;;  %v3026_v24 = vpop.f32.mrb[93].mxu1  ;;  %v4631_v41 = vadd.f32 %v1740_v20, %v1615_v0  ;;  %v3061_v9 = vpop.f32.mrb[95].mxu0 }
 0x256   : > { %v1554_v32 = vpop.f32.mrb[94].mxu1 }
 0x257   : > { %v1617_v58 = vadd.f32 %v1554_v32, %v4583_v30  ;;  %v3027_v27 = vpop.f32.mrb[95].mxu1 }
 0x25a   : > { %v1745_v23 = vpop.f32.mrb[96].mxu0 }
 0x25b   : > { %v4634_v54 = vadd.f32 %v1745_v23, %v1616_v63  ;;  %v3064_v3 = vpop.f32.mrb[97].mxu0 }
 0x25c   : > { %v1559_v40 = vpop.f32.mrb[96].mxu1  ;;  %v1748_v52 = vpop.f32.mrb[98].mxu0 }
 0x25d   : > { %v1618_v11 = vadd.f32 %v1559_v40, %v4586_v15  ;;  %v3030_v49 = vpop.f32.mrb[97].mxu1  ;;  %v4637_v10 = vadd.f32 %v1748_v52, %v1617_v58  ;;  %v3065_v5 = vpop.f32.mrb[99].mxu0 }
 0x25e   : > { %v1562_v13 = vpop.f32.mrb[98].mxu1 }
 0x25f   : > { %v1619_v61 = vadd.f32 %v1562_v13, %v4589_v45  ;;  %v3031_v34 = vpop.f32.mrb[99].mxu1 }
 0x262   : > { %v1753_v14 = vpop.f32.mrb[100].mxu0 }
 0x263   : > { %v4640_v29 = vadd.f32 %v1753_v14, %v1618_v11  ;;  %v3068_v30 = vpop.f32.mrb[101].mxu0 }
 0x264   : > { %v1567_v42 = vpop.f32.mrb[100].mxu1  ;;  %v1756_v12 = vpop.f32.mrb[102].mxu0 }
 0x265   : > { %v1620_v28 = vadd.f32 %v1567_v42, %v4592_v53  ;;  %v3034_v60 = vpop.f32.mrb[101].mxu1  ;;  %v4643_v19 = vadd.f32 %v1756_v12, %v1619_v61  ;;  %v3069_v15 = vpop.f32.mrb[103].mxu0 }
 0x266   : > { %v1570_v44 = vpop.f32.mrb[102].mxu1 }
 0x267   : > { %v1621_v26 = vadd.f32 %v1570_v44, %v4595_v46  ;;  %v3035_v50 = vpop.f32.mrb[103].mxu1 }
 0x26a   : > { %v1761_v18 = vpop.f32.mrb[104].mxu0 }
 0x26b   : > { %v4646_v25 = vadd.f32 %v1761_v18, %v1620_v28  ;;  %v3072_v45 = vpop.f32.mrb[105].mxu0 }
 0x26c   : > { %v1575_v59 = vpop.f32.mrb[104].mxu1  ;;  %v1764_v43 = vpop.f32.mrb[106].mxu0 }
 0x26d   : > { %v1622_v55 = vadd.f32 %v1575_v59, %v4598_v38  ;;  %v3038_v56 = vpop.f32.mrb[105].mxu1  ;;  %v4649_v48 = vadd.f32 %v1764_v43, %v1621_v26  ;;  %v3073_v53 = vpop.f32.mrb[107].mxu0 }
 0x26e   : > { %v1578_v7 = vpop.f32.mrb[106].mxu1 }
 0x26f   : > { %v1623_v4 = vadd.f32 %v1578_v7, %v4601_v1  ;;  %v3039_v2 = vpop.f32.mrb[107].mxu1 }
 0x272   : > { %v1769_v47 = vpop.f32.mrb[108].mxu0 }
 0x273   : > { %v4652_v39 = vadd.f32 %v1769_v47, %v1622_v55  ;;  %v3076_v46 = vpop.f32.mrb[109].mxu0 }
 0x274   : > { %v1583_v62 = vpop.f32.mrb[108].mxu1  ;;  %v1772_v0 = vpop.f32.mrb[110].mxu0 }
 0x275   : > { %v1624_v36 = vadd.f32 %v1583_v62, %v4604_v8  ;;  %v3042_v16 = vpop.f32.mrb[109].mxu1  ;;  %v4655_v31 = vadd.f32 %v1772_v0, %v1623_v4  ;;  %v3077_v38 = vpop.f32.mrb[111].mxu0 }
 0x276   : > { %v1586_v21 = vpop.f32.mrb[110].mxu1  ;;  %v4682_v38 = vld [vmem:[#allocation9] ss:$0 sm:$0xff] }
 0x277   : > { %v1625_v20 = vadd.f32 %v1586_v21, %v4607_v35  ;;  %v3043_v63 = vpop.f32.mrb[111].mxu1 }
 0x27a   : > { %v1777_v24 = vpop.f32.mrb[112].mxu0 }
 0x27b   : > { %v4658_v9 = vadd.f32 %v1777_v24, %v1624_v36  ;;  %v3080_v1 = vpop.f32.mrb[113].mxu0 }
 0x27c   : > { %v1591_v32 = vpop.f32.mrb[112].mxu1  ;;  %v1780_v58 = vpop.f32.mrb[114].mxu0 }
 0x27d   : > { %v1626_v27 = vadd.f32 %v1591_v32, %v4610_v22  ;;  %v3046_v23 = vpop.f32.mrb[113].mxu1  ;;  %v4661_v3 = vadd.f32 %v1780_v58, %v1625_v20  ;;  %v3081_v8 = vpop.f32.mrb[115].mxu0 }
 0x27e   : > { %v1594_v40 = vpop.f32.mrb[114].mxu1 }
 0x27f   : > { %v1627_v52 = vadd.f32 %v1594_v40, %v4613_v33  ;;  %v3047_v11 = vpop.f32.mrb[115].mxu1 }
 0x282   : > { %v1785_v49 = vpop.f32.mrb[116].mxu0 }
 0x283   : > { %v4664_v5 = vadd.f32 %v1785_v49, %v1626_v27  ;;  %v3084_v35 = vpop.f32.mrb[117].mxu0 }
 0x284   : > { %v1599_v13 = vpop.f32.mrb[116].mxu1  ;;  %v1788_v61 = vpop.f32.mrb[118].mxu0 }
 0x285   : > { %v1628_v34 = vadd.f32 %v1599_v13, %v4616_v37  ;;  %v3050_v14 = vpop.f32.mrb[117].mxu1  ;;  %v4667_v30 = vadd.f32 %v1788_v61, %v1627_v52  ;;  %v3085_v22 = vpop.f32.mrb[119].mxu0 }
 0x286   : > { %v1602_v42 = vpop.f32.mrb[118].mxu1 }
 0x287   : > { %v1629_v12 = vadd.f32 %v1602_v42, %v4619_v57  ;;  %v3051_v28 = vpop.f32.mrb[119].mxu1 }
 0x28a   : > { %v1793_v60 = vpop.f32.mrb[120].mxu0 }
 0x28b   : > { %v4670_v15 = vadd.f32 %v1793_v60, %v1628_v34  ;;  %v3088_v33 = vpop.f32.mrb[121].mxu0 }
 0x28c   : > { %v1607_v44 = vpop.f32.mrb[120].mxu1  ;;  %v1796_v26 = vpop.f32.mrb[122].mxu0 }
 0x28d   : > { %v1630_v50 = vadd.f32 %v1607_v44, %v4622_v51  ;;  %v3054_v18 = vpop.f32.mrb[121].mxu1  ;;  %v4673_v45 = vadd.f32 %v1796_v26, %v1629_v12  ;;  %v3089_v37 = vpop.f32.mrb[123].mxu0 }
 0x28e   : > { %v1610_v59 = vpop.f32.mrb[122].mxu1 }
 0x28f   : > { %v1631_v43 = vadd.f32 %v1610_v59, %v4625_v17  ;;  %v3055_v55 = vpop.f32.mrb[123].mxu1 }
 0x292   : > { %v1801_v56 = vpop.f32.mrb[124].mxu0 }
 0x293   : > { %v4676_v53 = vadd.f32 %v1801_v56, %v1630_v50  ;;  %v3092_v57 = vpop.f32.mrb[125].mxu0 }
 0x294   : > { %v1983_v7 = vpop.f32.mrb[124].mxu1  ;;  %v1804_v4 = vpop.f32.mrb[126].mxu0 }
 0x295   : > { %v2054_v2 = vadd.f32 %v1983_v7, %v4628_v6  ;;  %v3098_v47 = vpop.f32.mrb[125].mxu1  ;;  %v4679_v46 = vadd.f32 %v1804_v4, %v1631_v43  ;;  %v3093_v51 = vpop.f32.mrb[127].mxu0 }
 0x296   : > { %v1986_v62 = vpop.f32.mrb[126].mxu1 }
 0x297   : > { %v2055_v0 = vadd.f32 %v1986_v62, %v4631_v41  ;;  %v3099_v36 = vpop.f32.mrb[127].mxu1 }
 0x29a   : > { %v2161_v16 = vpop.f32.mrb[128].mxu0 }
 0x29b   : > { %v2232_v17 = vadd.f32 %v2161_v16, %v2054_v2  ;;  %v3136_v21 = vpop.f32.mrb[129].mxu0 }
 0x29c   : > { %v1991_v20 = vpop.f32.mrb[128].mxu1  ;;  %v2164_v63 = vpop.f32.mrb[130].mxu0 }
 0x29d   : > { %v2056_v24 = vadd.f32 %v1991_v20, %v4634_v54  ;;  %v2257_v1 = vadd.f32 %v4682_v38, %v2232_v17  ;;  %v3102_v6 = vpop.f32.mrb[129].mxu1  ;;  %v2233_v32 = vadd.f32 %v2164_v63, %v2055_v0  ;;  %v3137_v58 = vpop.f32.mrb[131].mxu0 }
 0x29e   : > { %v1994_v27 = vpop.f32.mrb[130].mxu1 }
 0x29f   : > { %v2057_v23 = vadd.f32 %v1994_v27, %v4637_v10  ;;  %v2258_v41 = vadd.f32 %v4682_v38, %v2233_v32  ;;  %v3103_v8 = vpop.f32.mrb[131].mxu1  ;;  %v2275_v40 = vmax.f32 %v2257_v1, 0.0 }
 0x2a1   : > { %v2276_v52 = vmax.f32 %v2258_v41, 0.0 }
 0x2a2   : > { %v2169_v11 = vpop.f32.mrb[132].mxu0 }
 0x2a3   : > { %v2688_v49 = vpack.c.bf16 %v2276_v52, %v2275_v40  ;;  %v2234_v35 = vadd.f32 %v2169_v11, %v2056_v24  ;;  %v3140_v13 = vpop.f32.mrb[133].mxu0 }
 0x2a4   : > { %v1999_v61 = vpop.f32.mrb[132].mxu1  ;;  %v2172_v54 = vpop.f32.mrb[134].mxu0 }
 0x2a5   : > { %2689 = vst [vmem:[%s4690_s26] sm:$0xff] %v2688_v49   ;;  %v2058_v34 = vadd.f32 %v1999_v61, %v4640_v29  ;;  %v2259_v10 = vadd.f32 %v4682_v38, %v2234_v35  ;;  %v3106_v14 = vpop.f32.mrb[133].mxu1  ;;  %v2235_v22 = vadd.f32 %v2172_v54, %v2057_v23  ;;  %v3141_v42 = vpop.f32.mrb[135].mxu0 }
 0x2a6   : > { %v2002_v12 = vpop.f32.mrb[134].mxu1 }
 0x2a7   : > { %v2059_v28 = vadd.f32 %v2002_v12, %v4643_v19  ;;  %v2260_v60 = vadd.f32 %v4682_v38, %v2235_v22  ;;  %v3107_v33 = vpop.f32.mrb[135].mxu1  ;;  %v2277_v44 = vmax.f32 %v2259_v10, 0.0 }
 0x2a9   : > { %v2278_v26 = vmax.f32 %v2260_v60, 0.0 }
 0x2aa   : > { %v2177_v50 = vpop.f32.mrb[136].mxu0 }
 0x2ab   : > { %v2693_v18 = vpack.c.bf16 %v2278_v26, %v2277_v44  ;;  %v2236_v37 = vadd.f32 %v2177_v50, %v2058_v34  ;;  %v3144_v59 = vpop.f32.mrb[137].mxu0 }
 0x2ac   : > { %v2007_v43 = vpop.f32.mrb[136].mxu1  ;;  %v2180_v29 = vpop.f32.mrb[138].mxu0 }
 0x2ad   : > { %2730 = vst [vmem:[%s4690_s26 + $0x8] sm:$0xff] %v2693_v18   ;;  %v2060_v55 = vadd.f32 %v2007_v43, %v4646_v25  ;;  %v2261_v56 = vadd.f32 %v4682_v38, %v2236_v37  ;;  %v3110_v57 = vpop.f32.mrb[137].mxu1  ;;  %v2237_v7 = vadd.f32 %v2180_v29, %v2059_v28  ;;  %v3145_v19 = vpop.f32.mrb[139].mxu0 }
 0x2ae   : > { %v2010_v4 = vpop.f32.mrb[138].mxu1 }
 0x2af   : > { %v2061_v2 = vadd.f32 %v2010_v4, %v4649_v48  ;;  %v2262_v47 = vadd.f32 %v4682_v38, %v2237_v7  ;;  %v3111_v51 = vpop.f32.mrb[139].mxu1  ;;  %v2279_v62 = vmax.f32 %v2261_v56, 0.0 }
 0x2b1   : > { %v2280_v0 = vmax.f32 %v2262_v47, 0.0 }
 0x2b2   : > { %v2185_v36 = vpop.f32.mrb[140].mxu0 }
 0x2b3   : > { %v2698_v16 = vpack.c.bf16 %v2280_v0, %v2279_v62  ;;  %v2238_v17 = vadd.f32 %v2185_v36, %v2060_v55  ;;  %v3148_v21 = vpop.f32.mrb[141].mxu0 }
 0x2b4   : > { %v2015_v20 = vpop.f32.mrb[140].mxu1  ;;  %v2188_v25 = vpop.f32.mrb[142].mxu0 }
 0x2b5   : > { %2731 = vst [vmem:[%s4690_s26 + $0x10] sm:$0xff] %v2698_v16   ;;  %v2062_v63 = vadd.f32 %v2015_v20, %v4652_v39  ;;  %v2263_v24 = vadd.f32 %v4682_v38, %v2238_v17  ;;  %v3114_v1 = vpop.f32.mrb[141].mxu1  ;;  %v2239_v6 = vadd.f32 %v2188_v25, %v2061_v2  ;;  %v3149_v48 = vpop.f32.mrb[143].mxu0 }
 0x2b6   : > { %v2018_v32 = vpop.f32.mrb[142].mxu1 }
 0x2b7   : > { %v2063_v58 = vadd.f32 %v2018_v32, %v4655_v31  ;;  %v2264_v27 = vadd.f32 %v4682_v38, %v2239_v6  ;;  %v3115_v23 = vpop.f32.mrb[143].mxu1  ;;  %v2281_v41 = vmax.f32 %v2263_v24, 0.0 }
 0x2b9   : > { %v2282_v8 = vmax.f32 %v2264_v27, 0.0 }
 0x2ba   : > { %v2193_v40 = vpop.f32.mrb[144].mxu0 }
 0x2bb   : > { %v2703_v52 = vpack.c.bf16 %v2282_v8, %v2281_v41  ;;  %v2240_v11 = vadd.f32 %v2193_v40, %v2062_v63  ;;  %v3152_v49 = vpop.f32.mrb[145].mxu0 }
 0x2bc   : > { %v2023_v35 = vpop.f32.mrb[144].mxu1  ;;  %v2196_v39 = vpop.f32.mrb[146].mxu0 }
 0x2bd   : > { %2732 = vst [vmem:[%s4690_s26 + $0x18] sm:$0xff] %v2703_v52   ;;  %v2064_v13 = vadd.f32 %v2023_v35, %v4658_v9  ;;  %v2265_v61 = vadd.f32 %v4682_v38, %v2240_v11  ;;  %v3118_v54 = vpop.f32.mrb[145].mxu1  ;;  %v2241_v34 = vadd.f32 %v2196_v39, %v2063_v58  ;;  %v3153_v31 = vpop.f32.mrb[147].mxu0 }
 0x2be   : > { %v2026_v10 = vpop.f32.mrb[146].mxu1 }
 0x2bf   : > { %v2065_v14 = vadd.f32 %v2026_v10, %v4661_v3  ;;  %v2266_v22 = vadd.f32 %v4682_v38, %v2241_v34  ;;  %v3119_v42 = vpop.f32.mrb[147].mxu1  ;;  %v2283_v12 = vmax.f32 %v2265_v61, 0.0 }
 0x2c1   : > { %v2284_v28 = vmax.f32 %v2266_v22, 0.0 }
 0x2c2   : > { %v2201_v60 = vpop.f32.mrb[148].mxu0 }
 0x2c3   : > { %v2708_v33 = vpack.c.bf16 %v2284_v28, %v2283_v12  ;;  %v2242_v44 = vadd.f32 %v2201_v60, %v2064_v13  ;;  %v3156_v26 = vpop.f32.mrb[149].mxu0 }
 0x2c4   : > { %v2031_v50 = vpop.f32.mrb[148].mxu1  ;;  %v2204_v9 = vpop.f32.mrb[150].mxu0 }
 0x2c5   : > { %2733 = vst [vmem:[%s4690_s26 + $0x20] sm:$0xff] %v2708_v33   ;;  %v2066_v18 = vadd.f32 %v2031_v50, %v4664_v5  ;;  %v2267_v37 = vadd.f32 %v4682_v38, %v2242_v44  ;;  %v3122_v59 = vpop.f32.mrb[149].mxu1  ;;  %v2243_v43 = vadd.f32 %v2204_v9, %v2065_v14  ;;  %v3157_v3 = vpop.f32.mrb[151].mxu0 }
 0x2c6   : > { %v2034_v29 = vpop.f32.mrb[150].mxu1 }
 0x2c7   : > { %v2067_v55 = vadd.f32 %v2034_v29, %v4667_v30  ;;  %v2268_v56 = vadd.f32 %v4682_v38, %v2243_v43  ;;  %v3123_v57 = vpop.f32.mrb[151].mxu1  ;;  %v2285_v7 = vmax.f32 %v2267_v37, 0.0 }
 0x2c9   : > { %v2286_v19 = vmax.f32 %v2268_v56, 0.0 }
 0x2ca   : > { %v2209_v4 = vpop.f32.mrb[152].mxu0 }
 0x2cb   : > { %v2713_v2 = vpack.c.bf16 %v2286_v19, %v2285_v7  ;;  %v2244_v47 = vadd.f32 %v2209_v4, %v2066_v18  ;;  %v3160_v51 = vpop.f32.mrb[153].mxu0 }
 0x2cc   : > { %v2039_v62 = vpop.f32.mrb[152].mxu1  ;;  %v2212_v5 = vpop.f32.mrb[154].mxu0 }
 0x2cd   : > { %2734 = vst [vmem:[%s4690_s26 + $0x28] sm:$0xff] %v2713_v2   ;;  %v2068_v0 = vadd.f32 %v2039_v62, %v4670_v15  ;;  %v2269_v36 = vadd.f32 %v4682_v38, %v2244_v47  ;;  %v3126_v16 = vpop.f32.mrb[153].mxu1  ;;  %v2245_v17 = vadd.f32 %v2212_v5, %v2067_v55  ;;  %v3161_v30 = vpop.f32.mrb[155].mxu0 }
 0x2ce   : > { %v2042_v21 = vpop.f32.mrb[154].mxu1 }
 0x2cf   : > { %v2069_v20 = vadd.f32 %v2042_v21, %v4673_v45  ;;  %v2270_v25 = vadd.f32 %v4682_v38, %v2245_v17  ;;  %v3127_v63 = vpop.f32.mrb[155].mxu1  ;;  %v2287_v24 = vmax.f32 %v2269_v36, 0.0 }
 0x2d1   : > { %v2288_v1 = vmax.f32 %v2270_v25, 0.0 }
 0x2d2   : > { %v2217_v6 = vpop.f32.mrb[156].mxu0 }
 0x2d3   : > { %v2718_v48 = vpack.c.bf16 %v2288_v1, %v2287_v24  ;;  %v2246_v32 = vadd.f32 %v2217_v6, %v2068_v0  ;;  %v3164_v58 = vpop.f32.mrb[157].mxu0 }
 0x2d4   : > { %v2047_v15 = vpop.f32.mrb[156].mxu1  ;;  %v2220_v27 = vpop.f32.mrb[158].mxu0 }
 0x2d5   : > { %2735 = vst [vmem:[%s4690_s26 + $0x30] sm:$0xff] %v2718_v48   ;;  %v2070_v23 = vadd.f32 %v2047_v15, %v4676_v53  ;;  %v2271_v41 = vadd.f32 %v4682_v38, %v2246_v32  ;;  %v3130_v8 = vpop.f32.mrb[157].mxu1  ;;  %v2247_v45 = vadd.f32 %v2220_v27, %v2069_v20  ;;  %v3165_v40 = vpop.f32.mrb[159].mxu0 }
 0x2d6   : > { %v2050_v52 = vpop.f32.mrb[158].mxu1 }
 0x2d7   : > { %v2071_v11 = vadd.f32 %v2050_v52, %v4679_v46  ;;  %v2272_v49 = vadd.f32 %v4682_v38, %v2247_v45  ;;  %v3131_v35 = vpop.f32.mrb[159].mxu1  ;;  %v2289_v39 = vmax.f32 %v2271_v41, 0.0 }
 0x2d9   : > { %v2290_v13 = vmax.f32 %v2272_v49, 0.0 }
 0x2da   : > { %v2225_v61 = vpop.f32.mrb[160].mxu0 }
 0x2db   : > { %v2723_v54 = vpack.c.bf16 %v2290_v13, %v2289_v39  ;;  %v2248_v53 = vadd.f32 %v2225_v61, %v2070_v23  ;;  %v3168_v34 = vpop.f32.mrb[161].mxu0 }
 0x2dc   : > { %v2228_v31 = vpop.f32.mrb[162].mxu0 }
 0x2dd   : > { %2736 = vst [vmem:[%s4690_s26 + $0x38] sm:$0xff] %v2723_v54   ;;  %v2273_v10 = vadd.f32 %v4682_v38, %v2248_v53  ;;  %v2249_v46 = vadd.f32 %v2228_v31, %v2071_v11  ;;  %v3169_v14 = vpop.f32.mrb[163].mxu0 }
 0x2df   : > { %v2274_v22 = vadd.f32 %v4682_v38, %v2249_v46  ;;  %v2291_v42 = vmax.f32 %v2273_v10, 0.0 }
 0x2e1   : > { %v2292_v12 = vmax.f32 %v2274_v22, 0.0 }
 0x2e3   : > { %v2728_v28 = vpack.c.bf16 %v2292_v12, %v2291_v42 }
 0x2e5   : > { %2737 = vst [vmem:[%s4690_s26 + $0x40] sm:$0xff] %v2728_v28  }
 0x2e6   : > { %3460 = shalt.err (!%p3457_p13)
}
 0x2e7   : > { %s3461_s24 = scalar_lea.hbm %s4738_s30, 1152  ;;  %s3465_s18 = scalar_lea.hbm %s4860_s8, 4608 }
 0x2e8   : > { %p3462_p0 = scmp.ne.s32.totalorder %s4738_s30, %s3461_s24  ;;  %p3466_p3 = scmp.lt.u32.totalorder %s4738_s30, %s4860_s8 }
 0x2e9   : > { %p3467_p11 = scmp.lt.u32.totalorder %s3465_s18, %s3461_s24  ;;  %p3469_p9 = scmp.lt.u32.totalorder %s3461_s24, %s4738_s30 }
 0x2ea   : > { %p3463_p2 = pnand %p3462_p0, %p4861_p12 }
 0x2eb   : > { %p3468_p5 = por %p3467_p11, %p3466_p3 }
 0x2ec   : > { %p3464_p1 = pneg %p3463_p2 }
 0x2ed   : > { %p3470_p8 = por %p3469_p9, %p3468_p5 }
 0x2ef   : > { %p3471_p4 = pnand %p3470_p8, %p3464_p1 }
 0x2f1   : > { %3474 = shalt.err (!%p3471_p4)
}
 0x2f2   : > { %s3592_s28 = smov 64   ;;  %s3593_s29 = smov 4  }
 0x2f3   : > { %3190 = dma.vmem_to_hbm [thread:$0]  (%p4861_p12), %s4733_s21, 1152, %s4738_s30, %s2384_s7, %s3592_s28, %s3592_s28, %s3593_s29  }
 0x2f4 PF: > { %s4862_s4 = sld [smem:[#allocation17_spill]]  ;;  %s4863_s12 = sld [smem:[#allocation19_spill]] }
 0x2f5   : > { %p3215_p7 = scmp.ge.s32.totalorder %s3581_s25, 2 }
 0x2fa   : > { %s2414_s22 = sand.u32 1, %s4862_s4   ;;  %p4864_p6 = scmp.ne.s32.totalorder %s4863_s12, 0 }
 0x2fb   : > { %s2415_s14 = scalar_lea.sflag [#allocation5], %s2414_s22 }
 0x2fc   : > { %p3207_p10 = pnand %p3215_p7, %p4864_p6 }
 0x2fe   : > { %3536 = dma.done.wait (!%p3207_p10), %s2415_s14, 1152  }
 0x2ff   : > { %3538 = vsyncadd (!%p3207_p10), %s2415_s14, 4294966144  ;;  %s24_s25 = sadd.s32 1, %s3581_s25   ;;  %s4865_s22 = sld [smem:[#allocation18_spill]] }
 0x300   : > { %p21_p13 = scmp.ge.s32.totalorder %s24_s25, 6   ;;  %s4866_s27 = sld [smem:[#allocation20_spill]] }
 0x301   : > { %s4867_s24 = sld [smem:[#allocation22_spill]]  ;;  %s4868_s15 = smov %s3545_s16 }
 0x302   : > { %s4869_s16 = smov %s3549_s17  ;;  %s4870_s17 = smov %s3857_s6 }
 0x303   : > { %s4871_s18 = smov %s3557_s19  ;;  %s4872_s19 = smov %s3561_s20 }
 0x304   : > { %s4873_s20 = smov %s3797_s2  ;;  %s4874_s21 = smov %s3573_s23 }
 0x305   :  { %23 = sbr.rel (!%p21_p13) target bundleno = 17 (0x11), region = 110 }
 0x306   : > { %s4875_s23 = smov %s4866_s27 }
 0x30c   :  { %2420 = vsyncpa [#allocation4], 1 }
 0x30d   :  { %2422 = vsyncpa [#allocation4 + $0x1], 1 }
 0x30e   :  { %2423 = vsyncpa [#allocation7], 1 }
 0x30f   :  { %2425 = vsyncpa [#allocation7 + $0x1], 1 }
 0x310   :  { %2426 = vsyncpa [#allocation10], 1 }
 0x311   :  { %2427 = vsyncpa [#allocation5], 1 }
 0x312   :  { %2429 = vsyncpa [#allocation5 + $0x1], 1 }

</bundles_post_ra>
